<compile_context>
chip_gen: v6e
topology: v6e:2x2x1
jax: 0.10.0
libtpu: 0.0.40
codegen_flags: <defaults>
</compile_context>

<pallas_src>
import jax
import jax.numpy as jnp
from jax.experimental import pallas as pl
from jax.experimental.pallas import tpu as pltpu

LANE = 128
VMEM_LIMIT = 32 * 1024 * 1024  # scoped-VMEM budget; safe headroom even on v7x (64 MiB)


# ----------------------------------------------------------------------------
# small helpers
# ----------------------------------------------------------------------------
def _round_up(x, m):
    return (x + m - 1) // m * m


def _pad_last(a, n):
    return jnp.pad(a, [(0, 0)] * (a.ndim - 1) + [(0, n - a.shape[-1])])


def _pad_last2(a, r, c):
    return jnp.pad(a, [(0, 0)] * (a.ndim - 2)
                   + [(0, r - a.shape[-2]), (0, c - a.shape[-1])])


def _full_spec(shape):
    nd = len(shape)
    return pl.BlockSpec(shape, lambda i, _nd=nd: (0,) * _nd)


# ----------------------------------------------------------------------------
# Kernel 1: SANFeedForward fused with the GRU input projection
#   y  = ReLU(ReLU(x @ W1 + b1) @ W2 + b2)
#   g? = y @ Wx_? + b_?      for ? in {z, r, n}   (time-independent -> hoisted)
# ----------------------------------------------------------------------------
def proj_kernel(x_ref, w1_ref, b1_ref, w2_ref, b2_ref, wx_ref, bg_ref,
                gz_ref, gr_ref, gn_ref):
    x = x_ref[...]                                                   # bf16 (TM, Din)
    h = jnp.dot(x, w1_ref[...], preferred_element_type=jnp.float32) + b1_ref[...]
    h = jnp.maximum(h, 0.0)
    y = jnp.dot(h.astype(jnp.bfloat16), w2_ref[...],
                preferred_element_type=jnp.float32) + b2_ref[...]
    y = jnp.maximum(y, 0.0).astype(jnp.bfloat16)
    for g, o_ref in enumerate((gz_ref, gr_ref, gn_ref)):             # gate-major split
        o_ref[...] = (jnp.dot(y, wx_ref[g], preferred_element_type=jnp.float32)
                      + bg_ref[g])


def ffn_gru_proj(x_tm, ffn, wx, bg, hp, tm_max=256):
    """x_tm: (N, Din) time-major flattened rows -> 3 gate pre-activations (N, hp)."""
    n, din = x_tm.shape
    n_pad = _round_up(n, 16)
    tm = tm_max if n_pad >= tm_max else n_pad
    n_pad = _round_up(n_pad, tm)
    x_tm = jnp.pad(x_tm, ((0, n_pad - n), (0, 0)))
    out_sds = jax.ShapeDtypeStruct((n_pad, hp), jnp.float32)

    gz, gr, gn = pl.pallas_call(
        proj_kernel,
        grid=(n_pad // tm,),
        in_specs=[
            pl.BlockSpec((tm, din), lambda i: (i, 0)),
            _full_spec(ffn["w1"].shape), _full_spec(ffn["b1"].shape),
            _full_spec(ffn["w2"].shape), _full_spec(ffn["b2"].shape),
            _full_spec(wx.shape), _full_spec(bg.shape),
        ],
        out_specs=[pl.BlockSpec((tm, hp), lambda i: (i, 0))] * 3,
        out_shape=(out_sds, out_sds, out_sds),
        compiler_params=pltpu.CompilerParams(
            dimension_semantics=("parallel",),          # megacore on v7x
            vmem_limit_bytes=VMEM_LIMIT),
    )(x_tm, ffn["w1"], ffn["b1"], ffn["w2"], ffn["b2"], wx, bg)
    return gz[:n], gr[:n], gn[:n]


# ----------------------------------------------------------------------------
# Kernel 2: masked (packed-sequence) GRU — only the recurrent part.
#   Inputs are pre-projected gate activations (time-major); whole arrays are
#   resident in VMEM (recurrence is serial, so per-step grid overhead would
#   dominate; sizes fit comfortably).
# ----------------------------------------------------------------------------
def gru_kernel(gz_ref, gr_ref, gn_ref, m_ref, wh_ref, o_ref):
    T, Bt, Hp = o_ref.shape
    whz = wh_ref[0]
    whr = wh_ref[1]
    whn = wh_ref[2]

    def step(t, h_prev):
        m_t = m_ref[t]                                               # (Bt, 1)
        ghz = jnp.dot(h_prev, whz, preferred_element_type=jnp.float32)
        ghr = jnp.dot(h_prev, whr, preferred_element_type=jnp.float32)
        ghn = jnp.dot(h_prev, whn, preferred_element_type=jnp.float32)
        z = jax.nn.sigmoid(gz_ref[t] + ghz)
        r = jax.nn.sigmoid(gr_ref[t] + ghr)
        n = jnp.tanh(gn_ref[t] + r * ghn)
        h_new = (1.0 - z) * n + z * h_prev
        h_new = m_t * h_new + (1.0 - m_t) * h_prev                   # freeze padded steps
        o_ref[t] = h_new                                             # lane-dense (Bt, Hp)
        return h_new

    jax.lax.fori_loop(0, T, step, jnp.zeros((Bt, Hp), jnp.float32))


# ----------------------------------------------------------------------------
# Kernel 3: DCRAttention + ChunkRepresentation + Ranker, one batch element per
#           grid step ("parallel" -> megacore).
# ----------------------------------------------------------------------------
def scr_head_kernel(hc_ref, hq_ref, cm_ref, qm_ref, cs_ref, ce_ref, sc_ref, o_ref):
    hc = hc_ref[...]                       # (Tc, Hp)  time-major, lane-dense
    hq = hq_ref[...]                       # (Tq, Hp)
    cm = cm_ref[0]                         # (1, Tc)
    qm = qm_ref[0]                         # (1, Tq)
    cs = cs_ref[0]                         # (K, 1) int32
    ce = ce_ref[0]                         # (K, 1) int32
    sc = sc_ref[0]                         # (K, 1)
    tc = hc.shape[0]
    k = cs.shape[0]

    # question representation: masked mean over question positions
    q_sum = jnp.dot(qm, hq, preferred_element_type=jnp.float32)          # (1, Hp)
    q_cnt = jnp.sum(qm, axis=-1, keepdims=True)
    q_rep = q_sum * pl.reciprocal(q_cnt + 1e-6, approx=True)

    # DCR attention: gammas over context words (softmax on the lane axis)
    scores = jax.lax.dot_general(q_rep, hc, (((1,), (1,)), ((), ())),
                                 preferred_element_type=jnp.float32)     # (1, Tc)
    scores = jnp.where(cm > 0.0, scores, -1e30)
    smax = jnp.max(scores, axis=-1, keepdims=True)
    e = jnp.exp(scores - smax) * cm
    gammas = e * pl.reciprocal(jnp.sum(e, axis=-1, keepdims=True) + 1e-6,
                               approx=True)                              # (1, Tc)

    # chunk representation: gamma-weighted sum of hc over each candidate span
    pos = jax.lax.broadcasted_iota(jnp.int32, (k, tc), 1)
    span = jnp.logical_and(pos >= cs, pos <= ce).astype(jnp.float32) * cm
    w = span * gammas                                                    # (K, Tc)
    chunk = jnp.dot(w, hc, preferred_element_type=jnp.float32)           # (K, Hp)

    # ranker: cosine similarity + external candidate scores, log-softmax over K
    num = jax.lax.dot_general(chunk, q_rep, (((1,), (1,)), ((), ())),
                              preferred_element_type=jnp.float32)        # (K, 1)
    cn = jnp.sqrt(jnp.sum(chunk * chunk, axis=-1, keepdims=True) + 1e-6)
    qn = jnp.sqrt(jnp.sum(q_rep * q_rep, axis=-1, keepdims=True) + 1e-6) # (1, 1)
    cos = num * pl.reciprocal(cn * qn, approx=True)
    logits = cos + sc                                                    # (K, 1)

    # TODO(synk): K stays sublane-narrow here; pad K to >=8 / lane-dense output at
    # realistic candidate counts.
    lmax = jnp.max(logits, axis=0, keepdims=True)
    lse = jnp.log(jnp.sum(jnp.exp(logits - lmax), axis=0, keepdims=True))
    o_ref[0] = logits - lmax - lse


# ----------------------------------------------------------------------------
# Parameter construction (deterministic, synthetic)
# ----------------------------------------------------------------------------
def init_params(key, vocab, n_pos, n_ner, hidden):
    ks = jax.random.split(key, 12)
    s = 0.1
    p = {}
    p["word_emb"] = s * jax.random.normal(ks[0], (vocab, 300), jnp.float32)
    p["word_emb"] = p["word_emb"].at[0].set(0.0)          # pad index 0 -> zero vector
    p["pos_emb"] = s * jax.random.normal(ks[1], (n_pos, 100), jnp.float32)
    p["ner_emb"] = s * jax.random.normal(ks[2], (n_ner, 100), jnp.float32)
    p["bem_emb"] = s * jax.random.normal(ks[3], (2, 100), jnp.float32)

    p["ffn_p"] = {
        "w1": s * jax.random.normal(ks[4], (600, hidden), jnp.float32),
        "b1": jnp.zeros((1, hidden), jnp.float32),
        "w2": s * jax.random.normal(ks[5], (hidden, hidden), jnp.float32),
        "b2": jnp.zeros((1, hidden), jnp.float32),
    }
    p["ffn_q"] = {
        "w1": s * jax.random.normal(ks[6], (300, hidden), jnp.float32),
        "b1": jnp.zeros((1, hidden), jnp.float32),
        "w2": s * jax.random.normal(ks[7], (hidden, hidden), jnp.float32),
        "b2": jnp.zeros((1, hidden), jnp.float32),
    }
    # GRU weights stored gate-major: (3, H, H) for [z, r, n]
    p["gru"] = {
        "wx": s * jax.random.normal(ks[8], (3, hidden, hidden), jnp.float32),
        "wh": s * jax.random.normal(ks[9], (3, hidden, hidden), jnp.float32),
        "b": jnp.zeros((3, 1, hidden), jnp.float32),
    }
    return p


# ----------------------------------------------------------------------------
# Full SCR forward
# ----------------------------------------------------------------------------
@jax.jit
def scr_forward(params, cw_idxs, qw_idxs, pos_idxs, ner_idxs, bem_idxs,
                candidates, candidate_scores):
    B, Tc = cw_idxs.shape
    Tq = qw_idxs.shape[1]
    H = params["ffn_p"]["w2"].shape[1]
    Hp = _round_up(max(H, LANE), LANE)            # lane-pad hidden (exact: padding stays 0)
    K = candidates.shape[1]
    Tmax = max(Tc, Tq)
    Bt = _round_up(2 * B, 8)                      # fused ctx+question batch, sublane-padded

    c_mask = (cw_idxs != 0).astype(jnp.float32)   # (B, Tc)
    q_mask = (qw_idxs != 0).astype(jnp.float32)   # (B, Tq)

    # --- Lexicon encoder: gathers done directly TIME-major (no HBM transpose later)
    cw = jnp.take(params["word_emb"], cw_idxs.T, axis=0)           # (Tc, B, 300)
    pe = jnp.take(params["pos_emb"], pos_idxs.T, axis=0)           # (Tc, B, 100)
    ne = jnp.take(params["ner_emb"], ner_idxs.T, axis=0)           # (Tc, B, 100)
    be = jnp.take(params["bem_emb"], bem_idxs.T, axis=0)           # (Tc, B, 100)
    R_p = jnp.concatenate([cw, pe, ne, be], axis=-1)               # (Tc, B, 600)
    R_q = jnp.take(params["word_emb"], qw_idxs.T, axis=0)          # (Tq, B, 300)

    Dp = _round_up(R_p.shape[-1], LANE)                            # 600 -> 640
    Dq = _round_up(R_q.shape[-1], LANE)                            # 300 -> 384
    xp = _pad_last(R_p, Dp).reshape(Tc * B, Dp).astype(jnp.bfloat16)
    xq = _pad_last(R_q, Dq).reshape(Tq * B, Dq).astype(jnp.bfloat16)

    def pad_ffn(p, din):
        return {
            "w1": _pad_last2(p["w1"], din, Hp).astype(jnp.bfloat16),
            "b1": _pad_last(p["b1"], Hp),
            "w2": _pad_last2(p["w2"], Hp, Hp).astype(jnp.bfloat16),
            "b2": _pad_last(p["b2"], Hp),
        }

    fp = pad_ffn(params["ffn_p"], Dp)
    fq = pad_ffn(params["ffn_q"], Dq)
    wx = _pad_last2(params["gru"]["wx"], Hp, Hp).astype(jnp.bfloat16)   # (3, Hp, Hp)
    wh = _pad_last2(params["gru"]["wh"], Hp, Hp)                        # (3, Hp, Hp) f32
    bg = _pad_last(params["gru"]["b"], Hp)                              # (3, 1, Hp)

    # --- FFN + GRU input projection (tiled, parallel, bf16 MXU / f32 accumulate)
    gz_c, gr_c, gn_c = ffn_gru_proj(xp, fp, wx, bg, Hp)   # each (Tc*B, Hp)
    gz_q, gr_q, gn_q = ffn_gru_proj(xq, fq, wx, bg, Hp)   # each (Tq*B, Hp)

    def assemble(gc, gq):
        gc = jnp.pad(gc.reshape(Tc, B, Hp), ((0, Tmax - Tc), (0, 0), (0, 0)))
        gq = jnp.pad(gq.reshape(Tq, B, Hp), ((0, Tmax - Tq), (0, 0), (0, 0)))
        g = jnp.concatenate([gc, gq], axis=1)                          # (Tmax, 2B, Hp)
        return jnp.pad(g, ((0, 0), (0, Bt - 2 * B), (0, 0)))           # (Tmax, Bt, Hp)

    gz = assemble(gz_c, gz_q)
    gr = assemble(gr_c, gr_q)
    gn = assemble(gn_c, gn_q)

    m_c = jnp.pad(c_mask.T, ((0, Tmax - Tc), (0, 0)))                  # (Tmax, B)
    m_q = jnp.pad(q_mask.T, ((0, Tmax - Tq), (0, 0)))                  # (Tmax, B)
    m_all = jnp.concatenate([m_c, m_q], axis=1)
    m_all = jnp.pad(m_all, ((0, 0), (0, Bt - 2 * B)))[:, :, None]      # (Tmax, Bt, 1)

    # --- Shared GRU encoder: context + question fused along the batch axis
    h_all = pl.pallas_call(
        gru_kernel,
        grid=(1,),
        in_specs=[_full_spec(gz.shape), _full_spec(gr.shape), _full_spec(gn.shape),
                  _full_spec(m_all.shape), _full_spec(wh.shape)],
        out_specs=_full_spec((Tmax, Bt, Hp)),
        out_shape=jax.ShapeDtypeStruct((Tmax, Bt, Hp), jnp.float32),
        compiler_params=pltpu.CompilerParams(
            dimension_semantics=("arbitrary",),
            vmem_limit_bytes=VMEM_LIMIT),
    )(gz, gr, gn, m_all, wh)

    # Batch b's hidden states live in lane columns [b*Hp, (b+1)*Hp) -> the head reads
    # per-batch column blocks directly, so no HBM transpose of the GRU output.
    h2d = h_all.reshape(Tmax, Bt * Hp)

    cm_h = c_mask[:, None, :]                                          # (B, 1, Tc)
    qm_h = q_mask[:, None, :]                                          # (B, 1, Tq)
    cs_h = candidates[:, :, 0:1].astype(jnp.int32)                     # (B, K, 1)
    ce_h = candidates[:, :, 1:2].astype(jnp.int32)                     # (B, K, 1)
    sc_h = candidate_scores.astype(jnp.float32)[:, :, None]            # (B, K, 1)

    out = pl.pallas_call(
        scr_head_kernel,
        grid=(B,),
        in_specs=[
            pl.BlockSpec((Tc, Hp), lambda b: (0, b)),                  # hc (context cols)
            pl.BlockSpec((Tq, Hp), lambda b, _off=B: (0, _off + b)),   # hq (question cols)
            pl.BlockSpec((1, 1, Tc), lambda b: (b, 0, 0)),
            pl.BlockSpec((1, 1, Tq), lambda b: (b, 0, 0)),
            pl.BlockSpec((1, K, 1), lambda b: (b, 0, 0)),
            pl.BlockSpec((1, K, 1), lambda b: (b, 0, 0)),
            pl.BlockSpec((1, K, 1), lambda b: (b, 0, 0)),
        ],
        out_specs=pl.BlockSpec((1, K, 1), lambda b: (b, 0, 0)),
        out_shape=jax.ShapeDtypeStruct((B, K, 1), jnp.float32),
        compiler_params=pltpu.CompilerParams(
            dimension_semantics=("parallel",),
            vmem_limit_bytes=VMEM_LIMIT),
    )(h2d, h2d, cm_h, qm_h, cs_h, ce_h, sc_h)
    return out[:, :, 0]                                                # (B, K) log-probs


# ----------------------------------------------------------------------------
# main
# ----------------------------------------------------------------------------
if __name__ == "__main__":
    B, Tc, Tq, H, K = 2, 16, 8, 32, 4
    VOCAB, N_POS, N_NER = 50, 12, 8

    key = jax.random.PRNGKey(0)
    k_param, k1, k2, k3, k4, k5, k6 = jax.random.split(key, 7)

    params = init_params(k_param, VOCAB, N_POS, N_NER, H)

    cw_idxs = jax.random.randint(k1, (B, Tc), 1, VOCAB).astype(jnp.int32)
    cw_idxs = cw_idxs.at[:, Tc - 3:].set(0)            # pad tail of context
    qw_idxs = jax.random.randint(k2, (B, Tq), 1, VOCAB).astype(jnp.int32)
    qw_idxs = qw_idxs.at[:, Tq - 2:].set(0)            # pad tail of question
    pos_idxs = jax.random.randint(k3, (B, Tc), 0, N_POS).astype(jnp.int32)
    ner_idxs = jax.random.randint(k4, (B, Tc), 0, N_NER).astype(jnp.int32)
    bem_idxs = jax.random.randint(k5, (B, Tc), 0, 2).astype(jnp.int32)

    starts = jax.random.randint(k6, (B, K), 0, Tc - 4).astype(jnp.int32)
    lengths = jnp.arange(1, K + 1, dtype=jnp.int32)[None, :]           # 1..K
    ends = jnp.minimum(starts + lengths, Tc - 4)
    candidates = jnp.stack([starts, ends], axis=-1)                    # (B, K, 2)
    candidate_scores = 0.01 * jnp.arange(B * K, dtype=jnp.float32).reshape(B, K)

    out = scr_forward(params, cw_idxs, qw_idxs, pos_idxs, ner_idxs, bem_idxs,
                      candidates, candidate_scores)
    out = jax.block_until_ready(out)

    assert out.shape == (B, K)
    assert bool(jnp.all(jnp.isfinite(out)))
    # log-softmax rows should sum to ~1 in prob space
    assert bool(jnp.allclose(jnp.sum(jnp.exp(out), axis=-1), 1.0, atol=1e-4))
    print("KERNEL_OK")
</pallas_src>

<mosaic_0001>
module attributes {stable_mosaic.version = 11 : i64} {
  func.func @proj_kernel(%arg0: i32, %arg1: memref<32x640xbf16, #tpu.memory_space<vmem>>, %arg2: memref<640x128xbf16, #tpu.memory_space<vmem>>, %arg3: memref<1x128xf32, #tpu.memory_space<vmem>>, %arg4: memref<128x128xbf16, #tpu.memory_space<vmem>>, %arg5: memref<1x128xf32, #tpu.memory_space<vmem>>, %arg6: memref<3x128x128xbf16, #tpu.memory_space<vmem>>, %arg7: memref<3x1x128xf32, #tpu.memory_space<vmem>>, %arg8: memref<32x128xf32, #tpu.memory_space<vmem>>, %arg9: memref<32x128xf32, #tpu.memory_space<vmem>>, %arg10: memref<32x128xf32, #tpu.memory_space<vmem>>) attributes {dimension_semantics = [#tpu.dimension_semantics<parallel>], iteration_bounds = array<i64: 1>, scalar_prefetch = 0 : i64, scratch_operands = 0 : i64, tpu.core_type = #tpu.core_type<tc>, window_params = [{transform_indices = @transform_0, window_bounds = array<i64: 32, 640>}, {pipeline_mode = #tpu.pipeline_mode<synchronous>, transform_indices = @transform_1, window_bounds = array<i64: 640, 128>}, {pipeline_mode = #tpu.pipeline_mode<synchronous>, transform_indices = @transform_2, window_bounds = array<i64: 1, 128>}, {pipeline_mode = #tpu.pipeline_mode<synchronous>, transform_indices = @transform_3, window_bounds = array<i64: 128, 128>}, {pipeline_mode = #tpu.pipeline_mode<synchronous>, transform_indices = @transform_4, window_bounds = array<i64: 1, 128>}, {pipeline_mode = #tpu.pipeline_mode<synchronous>, transform_indices = @transform_5, window_bounds = array<i64: 3, 128, 128>}, {pipeline_mode = #tpu.pipeline_mode<synchronous>, transform_indices = @transform_6, window_bounds = array<i64: 3, 1, 128>}, {transform_indices = @transform_7, window_bounds = array<i64: 32, 128>}, {transform_indices = @transform_8, window_bounds = array<i64: 32, 128>}, {transform_indices = @transform_9, window_bounds = array<i64: 32, 128>}]} {
    %c0 = arith.constant 0 : index
    %c0_0 = arith.constant 0 : index
    %0 = vector.load %arg1[%c0, %c0_0] : memref<32x640xbf16, #tpu.memory_space<vmem>>, vector<32x640xbf16>
    %c0_1 = arith.constant 0 : index
    %c0_2 = arith.constant 0 : index
    %1 = vector.load %arg2[%c0_1, %c0_2] : memref<640x128xbf16, #tpu.memory_space<vmem>>, vector<640x128xbf16>
    %cst = arith.constant dense<0.000000e+00> : vector<32x128xf32>
    %2 = tpu.matmul %0, %1, %cst {dimension_numbers = #tpu.dot_dimension_numbers<[1], [0], [0], [1], [0, 0, 1, 1], [], []>} : vector<32x640xbf16>, vector<640x128xbf16>, vector<32x128xf32> -> vector<32x128xf32>
    %c0_3 = arith.constant 0 : index
    %c0_4 = arith.constant 0 : index
    %3 = vector.load %arg3[%c0_3, %c0_4] : memref<1x128xf32, #tpu.memory_space<vmem>>, vector<1x128xf32>
    %4 = vector.broadcast %3 : vector<1x128xf32> to vector<32x128xf32>
    %5 = arith.addf %2, %4 : vector<32x128xf32>
    %cst_5 = arith.constant 0.000000e+00 : f32
    %6 = vector.broadcast %cst_5 : f32 to vector<32x128xf32>
    %7 = arith.maximumf %5, %6 : vector<32x128xf32>
    %8 = arith.truncf %7 : vector<32x128xf32> to vector<32x128xbf16>
    %c0_6 = arith.constant 0 : index
    %c0_7 = arith.constant 0 : index
    %9 = vector.load %arg4[%c0_6, %c0_7] : memref<128x128xbf16, #tpu.memory_space<vmem>>, vector<128x128xbf16>
    %cst_8 = arith.constant dense<0.000000e+00> : vector<32x128xf32>
    %10 = tpu.matmul %8, %9, %cst_8 {dimension_numbers = #tpu.dot_dimension_numbers<[1], [0], [0], [1], [0, 0, 1, 1], [], []>} : vector<32x128xbf16>, vector<128x128xbf16>, vector<32x128xf32> -> vector<32x128xf32>
    %c0_9 = arith.constant 0 : index
    %c0_10 = arith.constant 0 : index
    %11 = vector.load %arg5[%c0_9, %c0_10] : memref<1x128xf32, #tpu.memory_space<vmem>>, vector<1x128xf32>
    %12 = vector.broadcast %11 : vector<1x128xf32> to vector<32x128xf32>
    %13 = arith.addf %10, %12 : vector<32x128xf32>
    %cst_11 = arith.constant 0.000000e+00 : f32
    %14 = vector.broadcast %cst_11 : f32 to vector<32x128xf32>
    %15 = arith.maximumf %13, %14 : vector<32x128xf32>
    %16 = arith.truncf %15 : vector<32x128xf32> to vector<32x128xbf16>
    %c0_12 = arith.constant 0 : index
    %c0_13 = arith.constant 0 : index
    %c0_14 = arith.constant 0 : index
    %17 = vector.load %arg6[%c0_12, %c0_13, %c0_14] : memref<3x128x128xbf16, #tpu.memory_space<vmem>>, vector<1x128x128xbf16>
    %18 = vector.shape_cast %17 : vector<1x128x128xbf16> to vector<128x128xbf16>
    %cst_15 = arith.constant dense<0.000000e+00> : vector<32x128xf32>
    %19 = tpu.matmul %16, %18, %cst_15 {dimension_numbers = #tpu.dot_dimension_numbers<[1], [0], [0], [1], [0, 0, 1, 1], [], []>} : vector<32x128xbf16>, vector<128x128xbf16>, vector<32x128xf32> -> vector<32x128xf32>
    %c0_16 = arith.constant 0 : index
    %c0_17 = arith.constant 0 : index
    %c0_18 = arith.constant 0 : index
    %20 = vector.load %arg7[%c0_16, %c0_17, %c0_18] : memref<3x1x128xf32, #tpu.memory_space<vmem>>, vector<1x1x128xf32>
    %21 = vector.shape_cast %20 : vector<1x1x128xf32> to vector<1x128xf32>
    %22 = vector.broadcast %21 : vector<1x128xf32> to vector<32x128xf32>
    %23 = arith.addf %19, %22 : vector<32x128xf32>
    %c0_19 = arith.constant 0 : index
    %c0_20 = arith.constant 0 : index
    %24 = vector.load %arg8[%c0_19, %c0_20] : memref<32x128xf32, #tpu.memory_space<vmem>>, vector<32x128xf32>
    tpu.vector_store %arg8[%c0_19, %c0_20], %23 {strides = array<i32>} : memref<32x128xf32, #tpu.memory_space<vmem>>, vector<32x128xf32>,
    %c1 = arith.constant 1 : index
    %c0_21 = arith.constant 0 : index
    %c0_22 = arith.constant 0 : index
    %25 = vector.load %arg6[%c1, %c0_21, %c0_22] : memref<3x128x128xbf16, #tpu.memory_space<vmem>>, vector<1x128x128xbf16>
    %26 = vector.shape_cast %25 : vector<1x128x128xbf16> to vector<128x128xbf16>
    %cst_23 = arith.constant dense<0.000000e+00> : vector<32x128xf32>
    %27 = tpu.matmul %16, %26, %cst_23 {dimension_numbers = #tpu.dot_dimension_numbers<[1], [0], [0], [1], [0, 0, 1, 1], [], []>} : vector<32x128xbf16>, vector<128x128xbf16>, vector<32x128xf32> -> vector<32x128xf32>
    %c1_24 = arith.constant 1 : index
    %c0_25 = arith.constant 0 : index
    %c0_26 = arith.constant 0 : index
    %28 = vector.load %arg7[%c1_24, %c0_25, %c0_26] : memref<3x1x128xf32, #tpu.memory_space<vmem>>, vector<1x1x128xf32>
    %29 = vector.shape_cast %28 : vector<1x1x128xf32> to vector<1x128xf32>
    %30 = vector.broadcast %29 : vector<1x128xf32> to vector<32x128xf32>
    %31 = arith.addf %27, %30 : vector<32x128xf32>
    %c0_27 = arith.constant 0 : index
    %c0_28 = arith.constant 0 : index
    %32 = vector.load %arg9[%c0_27, %c0_28] : memref<32x128xf32, #tpu.memory_space<vmem>>, vector<32x128xf32>
    tpu.vector_store %arg9[%c0_27, %c0_28], %31 {strides = array<i32>} : memref<32x128xf32, #tpu.memory_space<vmem>>, vector<32x128xf32>,
    %c2 = arith.constant 2 : index
    %c0_29 = arith.constant 0 : index
    %c0_30 = arith.constant 0 : index
    %33 = vector.load %arg6[%c2, %c0_29, %c0_30] : memref<3x128x128xbf16, #tpu.memory_space<vmem>>, vector<1x128x128xbf16>
    %34 = vector.shape_cast %33 : vector<1x128x128xbf16> to vector<128x128xbf16>
    %cst_31 = arith.constant dense<0.000000e+00> : vector<32x128xf32>
    %35 = tpu.matmul %16, %34, %cst_31 {dimension_numbers = #tpu.dot_dimension_numbers<[1], [0], [0], [1], [0, 0, 1, 1], [], []>} : vector<32x128xbf16>, vector<128x128xbf16>, vector<32x128xf32> -> vector<32x128xf32>
    %c2_32 = arith.constant 2 : index
    %c0_33 = arith.constant 0 : index
    %c0_34 = arith.constant 0 : index
    %36 = vector.load %arg7[%c2_32, %c0_33, %c0_34] : memref<3x1x128xf32, #tpu.memory_space<vmem>>, vector<1x1x128xf32>
    %37 = vector.shape_cast %36 : vector<1x1x128xf32> to vector<1x128xf32>
    %38 = vector.broadcast %37 : vector<1x128xf32> to vector<32x128xf32>
    %39 = arith.addf %35, %38 : vector<32x128xf32>
    %c0_35 = arith.constant 0 : index
    %c0_36 = arith.constant 0 : index
    %40 = vector.load %arg10[%c0_35, %c0_36] : memref<32x128xf32, #tpu.memory_space<vmem>>, vector<32x128xf32>
    tpu.vector_store %arg10[%c0_35, %c0_36], %39 {strides = array<i32>} : memref<32x128xf32, #tpu.memory_space<vmem>>, vector<32x128xf32>,
    return
  }
  func.func @transform_0(%arg0: i32) -> (i32, i32) {
    %c0_i32 = arith.constant 0 : i32
    %c0_i32_0 = arith.constant 0 : i32
    return %arg0, %c0_i32 : i32, i32
  }
  func.func @transform_1(%arg0: i32) -> (i32, i32) {
    %c0_i32 = arith.constant 0 : i32
    %c0_i32_0 = arith.constant 0 : i32
    %c0_i32_1 = arith.constant 0 : i32
    return %c0_i32, %c0_i32_0 : i32, i32
  }
  func.func @transform_2(%arg0: i32) -> (i32, i32) {
    %c0_i32 = arith.constant 0 : i32
    %c0_i32_0 = arith.constant 0 : i32
    %c0_i32_1 = arith.constant 0 : i32
    return %c0_i32, %c0_i32_0 : i32, i32
  }
  func.func @transform_3(%arg0: i32) -> (i32, i32) {
    %c0_i32 = arith.constant 0 : i32
    %c0_i32_0 = arith.constant 0 : i32
    %c0_i32_1 = arith.constant 0 : i32
    return %c0_i32, %c0_i32_0 : i32, i32
  }
  func.func @transform_4(%arg0: i32) -> (i32, i32) {
    %c0_i32 = arith.constant 0 : i32
    %c0_i32_0 = arith.constant 0 : i32
    %c0_i32_1 = arith.constant 0 : i32
    return %c0_i32, %c0_i32_0 : i32, i32
  }
  func.func @transform_5(%arg0: i32) -> (i32, i32, i32) {
    %c0_i32 = arith.constant 0 : i32
    %c0_i32_0 = arith.constant 0 : i32
    %c0_i32_1 = arith.constant 0 : i32
    %c0_i32_2 = arith.constant 0 : i32
    return %c0_i32, %c0_i32_0, %c0_i32_1 : i32, i32, i32
  }
  func.func @transform_6(%arg0: i32) -> (i32, i32, i32) {
    %c0_i32 = arith.constant 0 : i32
    %c0_i32_0 = arith.constant 0 : i32
    %c0_i32_1 = arith.constant 0 : i32
    %c0_i32_2 = arith.constant 0 : i32
    return %c0_i32, %c0_i32_0, %c0_i32_1 : i32, i32, i32
  }
  func.func @transform_7(%arg0: i32) -> (i32, i32) {
    %c0_i32 = arith.constant 0 : i32
    %c0_i32_0 = arith.constant 0 : i32
    return %arg0, %c0_i32 : i32, i32
  }
  func.func @transform_8(%arg0: i32) -> (i32, i32) {
    %c0_i32 = arith.constant 0 : i32
    %c0_i32_0 = arith.constant 0 : i32
    return %arg0, %c0_i32 : i32, i32
  }
  func.func @transform_9(%arg0: i32) -> (i32, i32) {
    %c0_i32 = arith.constant 0 : i32
    %c0_i32_0 = arith.constant 0 : i32
    return %arg0, %c0_i32 : i32, i32
  }
}

module attributes {stable_mosaic.version = 11 : i64} {
  func.func @proj_kernel(%arg0: i32, %arg1: memref<16x384xbf16, #tpu.memory_space<vmem>>, %arg2: memref<384x128xbf16, #tpu.memory_space<vmem>>, %arg3: memref<1x128xf32, #tpu.memory_space<vmem>>, %arg4: memref<128x128xbf16, #tpu.memory_space<vmem>>, %arg5: memref<1x128xf32, #tpu.memory_space<vmem>>, %arg6: memref<3x128x128xbf16, #tpu.memory_space<vmem>>, %arg7: memref<3x1x128xf32, #tpu.memory_space<vmem>>, %arg8: memref<16x128xf32, #tpu.memory_space<vmem>>, %arg9: memref<16x128xf32, #tpu.memory_space<vmem>>, %arg10: memref<16x128xf32, #tpu.memory_space<vmem>>) attributes {dimension_semantics = [#tpu.dimension_semantics<parallel>], iteration_bounds = array<i64: 1>, scalar_prefetch = 0 : i64, scratch_operands = 0 : i64, tpu.core_type = #tpu.core_type<tc>, window_params = [{transform_indices = @transform_0, window_bounds = array<i64: 16, 384>}, {pipeline_mode = #tpu.pipeline_mode<synchronous>, transform_indices = @transform_1, window_bounds = array<i64: 384, 128>}, {pipeline_mode = #tpu.pipeline_mode<synchronous>, transform_indices = @transform_2, window_bounds = array<i64: 1, 128>}, {pipeline_mode = #tpu.pipeline_mode<synchronous>, transform_indices = @transform_3, window_bounds = array<i64: 128, 128>}, {pipeline_mode = #tpu.pipeline_mode<synchronous>, transform_indices = @transform_4, window_bounds = array<i64: 1, 128>}, {pipeline_mode = #tpu.pipeline_mode<synchronous>, transform_indices = @transform_5, window_bounds = array<i64: 3, 128, 128>}, {pipeline_mode = #tpu.pipeline_mode<synchronous>, transform_indices = @transform_6, window_bounds = array<i64: 3, 1, 128>}, {transform_indices = @transform_7, window_bounds = array<i64: 16, 128>}, {transform_indices = @transform_8, window_bounds = array<i64: 16, 128>}, {transform_indices = @transform_9, window_bounds = array<i64: 16, 128>}]} {
    %c0 = arith.constant 0 : index
    %c0_0 = arith.constant 0 : index
    %0 = vector.load %arg1[%c0, %c0_0] : memref<16x384xbf16, #tpu.memory_space<vmem>>, vector<16x384xbf16>
    %c0_1 = arith.constant 0 : index
    %c0_2 = arith.constant 0 : index
    %1 = vector.load %arg2[%c0_1, %c0_2] : memref<384x128xbf16, #tpu.memory_space<vmem>>, vector<384x128xbf16>
    %cst = arith.constant dense<0.000000e+00> : vector<16x128xf32>
    %2 = tpu.matmul %0, %1, %cst {dimension_numbers = #tpu.dot_dimension_numbers<[1], [0], [0], [1], [0, 0, 1, 1], [], []>} : vector<16x384xbf16>, vector<384x128xbf16>, vector<16x128xf32> -> vector<16x128xf32>
    %c0_3 = arith.constant 0 : index
    %c0_4 = arith.constant 0 : index
    %3 = vector.load %arg3[%c0_3, %c0_4] : memref<1x128xf32, #tpu.memory_space<vmem>>, vector<1x128xf32>
    %4 = vector.broadcast %3 : vector<1x128xf32> to vector<16x128xf32>
    %5 = arith.addf %2, %4 : vector<16x128xf32>
    %cst_5 = arith.constant 0.000000e+00 : f32
    %6 = vector.broadcast %cst_5 : f32 to vector<16x128xf32>
    %7 = arith.maximumf %5, %6 : vector<16x128xf32>
    %8 = arith.truncf %7 : vector<16x128xf32> to vector<16x128xbf16>
    %c0_6 = arith.constant 0 : index
    %c0_7 = arith.constant 0 : index
    %9 = vector.load %arg4[%c0_6, %c0_7] : memref<128x128xbf16, #tpu.memory_space<vmem>>, vector<128x128xbf16>
    %cst_8 = arith.constant dense<0.000000e+00> : vector<16x128xf32>
    %10 = tpu.matmul %8, %9, %cst_8 {dimension_numbers = #tpu.dot_dimension_numbers<[1], [0], [0], [1], [0, 0, 1, 1], [], []>} : vector<16x128xbf16>, vector<128x128xbf16>, vector<16x128xf32> -> vector<16x128xf32>
    %c0_9 = arith.constant 0 : index
    %c0_10 = arith.constant 0 : index
    %11 = vector.load %arg5[%c0_9, %c0_10] : memref<1x128xf32, #tpu.memory_space<vmem>>, vector<1x128xf32>
    %12 = vector.broadcast %11 : vector<1x128xf32> to vector<16x128xf32>
    %13 = arith.addf %10, %12 : vector<16x128xf32>
    %cst_11 = arith.constant 0.000000e+00 : f32
    %14 = vector.broadcast %cst_11 : f32 to vector<16x128xf32>
    %15 = arith.maximumf %13, %14 : vector<16x128xf32>
    %16 = arith.truncf %15 : vector<16x128xf32> to vector<16x128xbf16>
    %c0_12 = arith.constant 0 : index
    %c0_13 = arith.constant 0 : index
    %c0_14 = arith.constant 0 : index
    %17 = vector.load %arg6[%c0_12, %c0_13, %c0_14] : memref<3x128x128xbf16, #tpu.memory_space<vmem>>, vector<1x128x128xbf16>
    %18 = vector.shape_cast %17 : vector<1x128x128xbf16> to vector<128x128xbf16>
    %cst_15 = arith.constant dense<0.000000e+00> : vector<16x128xf32>
    %19 = tpu.matmul %16, %18, %cst_15 {dimension_numbers = #tpu.dot_dimension_numbers<[1], [0], [0], [1], [0, 0, 1, 1], [], []>} : vector<16x128xbf16>, vector<128x128xbf16>, vector<16x128xf32> -> vector<16x128xf32>
    %c0_16 = arith.constant 0 : index
    %c0_17 = arith.constant 0 : index
    %c0_18 = arith.constant 0 : index
    %20 = vector.load %arg7[%c0_16, %c0_17, %c0_18] : memref<3x1x128xf32, #tpu.memory_space<vmem>>, vector<1x1x128xf32>
    %21 = vector.shape_cast %20 : vector<1x1x128xf32> to vector<1x128xf32>
    %22 = vector.broadcast %21 : vector<1x128xf32> to vector<16x128xf32>
    %23 = arith.addf %19, %22 : vector<16x128xf32>
    %c0_19 = arith.constant 0 : index
    %c0_20 = arith.constant 0 : index
    %24 = vector.load %arg8[%c0_19, %c0_20] : memref<16x128xf32, #tpu.memory_space<vmem>>, vector<16x128xf32>
    tpu.vector_store %arg8[%c0_19, %c0_20], %23 {strides = array<i32>} : memref<16x128xf32, #tpu.memory_space<vmem>>, vector<16x128xf32>,
    %c1 = arith.constant 1 : index
    %c0_21 = arith.constant 0 : index
    %c0_22 = arith.constant 0 : index
    %25 = vector.load %arg6[%c1, %c0_21, %c0_22] : memref<3x128x128xbf16, #tpu.memory_space<vmem>>, vector<1x128x128xbf16>
    %26 = vector.shape_cast %25 : vector<1x128x128xbf16> to vector<128x128xbf16>
    %cst_23 = arith.constant dense<0.000000e+00> : vector<16x128xf32>
    %27 = tpu.matmul %16, %26, %cst_23 {dimension_numbers = #tpu.dot_dimension_numbers<[1], [0], [0], [1], [0, 0, 1, 1], [], []>} : vector<16x128xbf16>, vector<128x128xbf16>, vector<16x128xf32> -> vector<16x128xf32>
    %c1_24 = arith.constant 1 : index
    %c0_25 = arith.constant 0 : index
    %c0_26 = arith.constant 0 : index
    %28 = vector.load %arg7[%c1_24, %c0_25, %c0_26] : memref<3x1x128xf32, #tpu.memory_space<vmem>>, vector<1x1x128xf32>
    %29 = vector.shape_cast %28 : vector<1x1x128xf32> to vector<1x128xf32>
    %30 = vector.broadcast %29 : vector<1x128xf32> to vector<16x128xf32>
    %31 = arith.addf %27, %30 : vector<16x128xf32>
    %c0_27 = arith.constant 0 : index
    %c0_28 = arith.constant 0 : index
    %32 = vector.load %arg9[%c0_27, %c0_28] : memref<16x128xf32, #tpu.memory_space<vmem>>, vector<16x128xf32>
    tpu.vector_store %arg9[%c0_27, %c0_28], %31 {strides = array<i32>} : memref<16x128xf32, #tpu.memory_space<vmem>>, vector<16x128xf32>,
    %c2 = arith.constant 2 : index
    %c0_29 = arith.constant 0 : index
    %c0_30 = arith.constant 0 : index
    %33 = vector.load %arg6[%c2, %c0_29, %c0_30] : memref<3x128x128xbf16, #tpu.memory_space<vmem>>, vector<1x128x128xbf16>
    %34 = vector.shape_cast %33 : vector<1x128x128xbf16> to vector<128x128xbf16>
    %cst_31 = arith.constant dense<0.000000e+00> : vector<16x128xf32>
    %35 = tpu.matmul %16, %34, %cst_31 {dimension_numbers = #tpu.dot_dimension_numbers<[1], [0], [0], [1], [0, 0, 1, 1], [], []>} : vector<16x128xbf16>, vector<128x128xbf16>, vector<16x128xf32> -> vector<16x128xf32>
    %c2_32 = arith.constant 2 : index
    %c0_33 = arith.constant 0 : index
    %c0_34 = arith.constant 0 : index
    %36 = vector.load %arg7[%c2_32, %c0_33, %c0_34] : memref<3x1x128xf32, #tpu.memory_space<vmem>>, vector<1x1x128xf32>
    %37 = vector.shape_cast %36 : vector<1x1x128xf32> to vector<1x128xf32>
    %38 = vector.broadcast %37 : vector<1x128xf32> to vector<16x128xf32>
    %39 = arith.addf %35, %38 : vector<16x128xf32>
    %c0_35 = arith.constant 0 : index
    %c0_36 = arith.constant 0 : index
    %40 = vector.load %arg10[%c0_35, %c0_36] : memref<16x128xf32, #tpu.memory_space<vmem>>, vector<16x128xf32>
    tpu.vector_store %arg10[%c0_35, %c0_36], %39 {strides = array<i32>} : memref<16x128xf32, #tpu.memory_space<vmem>>, vector<16x128xf32>,
    return
  }
  func.func @transform_0(%arg0: i32) -> (i32, i32) {
    %c0_i32 = arith.constant 0 : i32
    %c0_i32_0 = arith.constant 0 : i32
    return %arg0, %c0_i32 : i32, i32
  }
  func.func @transform_1(%arg0: i32) -> (i32, i32) {
    %c0_i32 = arith.constant 0 : i32
    %c0_i32_0 = arith.constant 0 : i32
    %c0_i32_1 = arith.constant 0 : i32
    return %c0_i32, %c0_i32_0 : i32, i32
  }
  func.func @transform_2(%arg0: i32) -> (i32, i32) {
    %c0_i32 = arith.constant 0 : i32
    %c0_i32_0 = arith.constant 0 : i32
    %c0_i32_1 = arith.constant 0 : i32
    return %c0_i32, %c0_i32_0 : i32, i32
  }
  func.func @transform_3(%arg0: i32) -> (i32, i32) {
    %c0_i32 = arith.constant 0 : i32
    %c0_i32_0 = arith.constant 0 : i32
    %c0_i32_1 = arith.constant 0 : i32
    return %c0_i32, %c0_i32_0 : i32, i32
  }
  func.func @transform_4(%arg0: i32) -> (i32, i32) {
    %c0_i32 = arith.constant 0 : i32
    %c0_i32_0 = arith.constant 0 : i32
    %c0_i32_1 = arith.constant 0 : i32
    return %c0_i32, %c0_i32_0 : i32, i32
  }
  func.func @transform_5(%arg0: i32) -> (i32, i32, i32) {
    %c0_i32 = arith.constant 0 : i32
    %c0_i32_0 = arith.constant 0 : i32
    %c0_i32_1 = arith.constant 0 : i32
    %c0_i32_2 = arith.constant 0 : i32
    return %c0_i32, %c0_i32_0, %c0_i32_1 : i32, i32, i32
  }
  func.func @transform_6(%arg0: i32) -> (i32, i32, i32) {
    %c0_i32 = arith.constant 0 : i32
    %c0_i32_0 = arith.constant 0 : i32
    %c0_i32_1 = arith.constant 0 : i32
    %c0_i32_2 = arith.constant 0 : i32
    return %c0_i32, %c0_i32_0, %c0_i32_1 : i32, i32, i32
  }
  func.func @transform_7(%arg0: i32) -> (i32, i32) {
    %c0_i32 = arith.constant 0 : i32
    %c0_i32_0 = arith.constant 0 : i32
    return %arg0, %c0_i32 : i32, i32
  }
  func.func @transform_8(%arg0: i32) -> (i32, i32) {
    %c0_i32 = arith.constant 0 : i32
    %c0_i32_0 = arith.constant 0 : i32
    return %arg0, %c0_i32 : i32, i32
  }
  func.func @transform_9(%arg0: i32) -> (i32, i32) {
    %c0_i32 = arith.constant 0 : i32
    %c0_i32_0 = arith.constant 0 : i32
    return %arg0, %c0_i32 : i32, i32
  }
}

module attributes {stable_mosaic.version = 11 : i64} {
  func.func @gru_kernel(%arg0: i32, %arg1: memref<16x8x128xf32, #tpu.memory_space<vmem>>, %arg2: memref<16x8x128xf32, #tpu.memory_space<vmem>>, %arg3: memref<16x8x128xf32, #tpu.memory_space<vmem>>, %arg4: memref<16x8x1xf32, #tpu.memory_space<vmem>>, %arg5: memref<3x128x128xf32, #tpu.memory_space<vmem>>, %arg6: memref<16x8x128xf32, #tpu.memory_space<vmem>>) attributes {dimension_semantics = [#tpu.dimension_semantics<arbitrary>], iteration_bounds = array<i64: 1>, scalar_prefetch = 0 : i64, scratch_operands = 0 : i64, tpu.core_type = #tpu.core_type<tc>, window_params = [{pipeline_mode = #tpu.pipeline_mode<synchronous>, transform_indices = @transform_0, window_bounds = array<i64: 16, 8, 128>}, {pipeline_mode = #tpu.pipeline_mode<synchronous>, transform_indices = @transform_1, window_bounds = array<i64: 16, 8, 128>}, {pipeline_mode = #tpu.pipeline_mode<synchronous>, transform_indices = @transform_2, window_bounds = array<i64: 16, 8, 128>}, {pipeline_mode = #tpu.pipeline_mode<synchronous>, transform_indices = @transform_3, window_bounds = array<i64: 16, 8, 1>}, {pipeline_mode = #tpu.pipeline_mode<synchronous>, transform_indices = @transform_4, window_bounds = array<i64: 3, 128, 128>}, {pipeline_mode = #tpu.pipeline_mode<synchronous>, transform_indices = @transform_5, window_bounds = array<i64: 16, 8, 128>}]} {
    %c0 = arith.constant 0 : index
    %c0_0 = arith.constant 0 : index
    %c0_1 = arith.constant 0 : index
    %0 = vector.load %arg5[%c0, %c0_0, %c0_1] : memref<3x128x128xf32, #tpu.memory_space<vmem>>, vector<1x128x128xf32>
    %1 = vector.shape_cast %0 : vector<1x128x128xf32> to vector<128x128xf32>
    %c1 = arith.constant 1 : index
    %c0_2 = arith.constant 0 : index
    %c0_3 = arith.constant 0 : index
    %2 = vector.load %arg5[%c1, %c0_2, %c0_3] : memref<3x128x128xf32, #tpu.memory_space<vmem>>, vector<1x128x128xf32>
    %3 = vector.shape_cast %2 : vector<1x128x128xf32> to vector<128x128xf32>
    %c2 = arith.constant 2 : index
    %c0_4 = arith.constant 0 : index
    %c0_5 = arith.constant 0 : index
    %4 = vector.load %arg5[%c2, %c0_4, %c0_5] : memref<3x128x128xf32, #tpu.memory_space<vmem>>, vector<1x128x128xf32>
    %5 = vector.shape_cast %4 : vector<1x128x128xf32> to vector<128x128xf32>
    %cst = arith.constant 0.000000e+00 : f32
    %6 = vector.broadcast %cst : f32 to vector<8x128xf32>
    %c0_i32 = arith.constant 0 : i32
    %c16_i32 = arith.constant 16 : i32
    %7 = arith.addi %c0_i32, %c16_i32 : i32
    %c1_i32 = arith.constant 1 : i32
    %8 = scf.for %arg7 = %c0_i32 to %7 step %c1_i32 iter_args(%arg8 = %6) -> (vector<8x128xf32>)  : i32 {
      %9 = arith.index_cast %arg7 : i32 to index
      %c0_7 = arith.constant 0 : index
      %c0_8 = arith.constant 0 : index
      %10 = vector.load %arg4[%9, %c0_7, %c0_8] : memref<16x8x1xf32, #tpu.memory_space<vmem>>, vector<1x8x1xf32>
      %11 = vector.shape_cast %10 : vector<1x8x1xf32> to vector<8x1xf32>
      %cst_9 = arith.constant dense<0.000000e+00> : vector<8x128xf32>
      %12 = tpu.matmul %arg8, %1, %cst_9 {dimension_numbers = #tpu.dot_dimension_numbers<[1], [0], [0], [1], [0, 0, 1, 1], [], []>} : vector<8x128xf32>, vector<128x128xf32>, vector<8x128xf32> -> vector<8x128xf32>
      %cst_10 = arith.constant dense<0.000000e+00> : vector<8x128xf32>
      %13 = tpu.matmul %arg8, %3, %cst_10 {dimension_numbers = #tpu.dot_dimension_numbers<[1], [0], [0], [1], [0, 0, 1, 1], [], []>} : vector<8x128xf32>, vector<128x128xf32>, vector<8x128xf32> -> vector<8x128xf32>
      %cst_11 = arith.constant dense<0.000000e+00> : vector<8x128xf32>
      %14 = tpu.matmul %arg8, %5, %cst_11 {dimension_numbers = #tpu.dot_dimension_numbers<[1], [0], [0], [1], [0, 0, 1, 1], [], []>} : vector<8x128xf32>, vector<128x128xf32>, vector<8x128xf32> -> vector<8x128xf32>
      %15 = arith.index_cast %arg7 : i32 to index
      %c0_12 = arith.constant 0 : index
      %c0_13 = arith.constant 0 : index
      %16 = vector.load %arg1[%15, %c0_12, %c0_13] : memref<16x8x128xf32, #tpu.memory_space<vmem>>, vector<1x8x128xf32>
      %17 = vector.shape_cast %16 : vector<1x8x128xf32> to vector<8x128xf32>
      %18 = arith.addf %17, %12 : vector<8x128xf32>
      %19 = arith.negf %18 : vector<8x128xf32>
      %20 = math.exp %19 : vector<8x128xf32>
      %cst_14 = arith.constant 1.000000e+00 : f32
      %21 = vector.broadcast %cst_14 : f32 to vector<8x128xf32>
      %22 = arith.addf %21, %20 : vector<8x128xf32>
      %23 = arith.divf %21, %22 : vector<8x128xf32>
      %24 = arith.index_cast %arg7 : i32 to index
      %c0_15 = arith.constant 0 : index
      %c0_16 = arith.constant 0 : index
      %25 = vector.load %arg2[%24, %c0_15, %c0_16] : memref<16x8x128xf32, #tpu.memory_space<vmem>>, vector<1x8x128xf32>
      %26 = vector.shape_cast %25 : vector<1x8x128xf32> to vector<8x128xf32>
      %27 = arith.addf %26, %13 : vector<8x128xf32>
      %28 = arith.negf %27 : vector<8x128xf32>
      %29 = math.exp %28 : vector<8x128xf32>
      %cst_17 = arith.constant 1.000000e+00 : f32
      %30 = vector.broadcast %cst_17 : f32 to vector<8x128xf32>
      %31 = arith.addf %30, %29 : vector<8x128xf32>
      %32 = arith.divf %30, %31 : vector<8x128xf32>
      %33 = arith.index_cast %arg7 : i32 to index
      %c0_18 = arith.constant 0 : index
      %c0_19 = arith.constant 0 : index
      %34 = vector.load %arg3[%33, %c0_18, %c0_19] : memref<16x8x128xf32, #tpu.memory_space<vmem>>, vector<1x8x128xf32>
      %35 = vector.shape_cast %34 : vector<1x8x128xf32> to vector<8x128xf32>
      %36 = arith.mulf %32, %14 : vector<8x128xf32>
      %37 = arith.addf %35, %36 : vector<8x128xf32>
      %38 = math.tanh %37 : vector<8x128xf32>
      %cst_20 = arith.constant 1.000000e+00 : f32
      %39 = vector.broadcast %cst_20 : f32 to vector<8x128xf32>
      %40 = arith.subf %39, %23 : vector<8x128xf32>
      %41 = arith.mulf %40, %38 : vector<8x128xf32>
      %42 = arith.mulf %23, %arg8 : vector<8x128xf32>
      %43 = arith.addf %41, %42 : vector<8x128xf32>
      %44 = vector.broadcast %11 : vector<8x1xf32> to vector<8x128xf32>
      %45 = arith.mulf %44, %43 : vector<8x128xf32>
      %cst_21 = arith.constant 1.000000e+00 : f32
      %46 = vector.broadcast %cst_21 : f32 to vector<8x1xf32>
      %47 = arith.subf %46, %11 : vector<8x1xf32>
      %48 = vector.broadcast %47 : vector<8x1xf32> to vector<8x128xf32>
      %49 = arith.mulf %48, %arg8 : vector<8x128xf32>
      %50 = arith.addf %45, %49 : vector<8x128xf32>
      %51 = arith.index_cast %arg7 : i32 to index
      %c0_22 = arith.constant 0 : index
      %c0_23 = arith.constant 0 : index
      %52 = vector.load %arg6[%51, %c0_22, %c0_23] : memref<16x8x128xf32, #tpu.memory_space<vmem>>, vector<1x8x128xf32>
      %53 = vector.shape_cast %52 : vector<1x8x128xf32> to vector<8x128xf32>
      %54 = vector.shape_cast %50 : vector<8x128xf32> to vector<1x8x128xf32>
      tpu.vector_store %arg6[%51, %c0_22, %c0_23], %54 {strides = array<i32>} : memref<16x8x128xf32, #tpu.memory_space<vmem>>, vector<1x8x128xf32>,
      scf.yield %50 : vector<8x128xf32>
    }
    %c16_i32_6 = arith.constant 16 : i32
    return
  }
  func.func @transform_0(%arg0: i32) -> (i32, i32, i32) {
    %c0_i32 = arith.constant 0 : i32
    %c0_i32_0 = arith.constant 0 : i32
    %c0_i32_1 = arith.constant 0 : i32
    %c0_i32_2 = arith.constant 0 : i32
    return %c0_i32, %c0_i32_0, %c0_i32_1 : i32, i32, i32
  }
  func.func @transform_1(%arg0: i32) -> (i32, i32, i32) {
    %c0_i32 = arith.constant 0 : i32
    %c0_i32_0 = arith.constant 0 : i32
    %c0_i32_1 = arith.constant 0 : i32
    %c0_i32_2 = arith.constant 0 : i32
    return %c0_i32, %c0_i32_0, %c0_i32_1 : i32, i32, i32
  }
  func.func @transform_2(%arg0: i32) -> (i32, i32, i32) {
    %c0_i32 = arith.constant 0 : i32
    %c0_i32_0 = arith.constant 0 : i32
    %c0_i32_1 = arith.constant 0 : i32
    %c0_i32_2 = arith.constant 0 : i32
    return %c0_i32, %c0_i32_0, %c0_i32_1 : i32, i32, i32
  }
  func.func @transform_3(%arg0: i32) -> (i32, i32, i32) {
    %c0_i32 = arith.constant 0 : i32
    %c0_i32_0 = arith.constant 0 : i32
    %c0_i32_1 = arith.constant 0 : i32
    %c0_i32_2 = arith.constant 0 : i32
    return %c0_i32, %c0_i32_0, %c0_i32_1 : i32, i32, i32
  }
  func.func @transform_4(%arg0: i32) -> (i32, i32, i32) {
    %c0_i32 = arith.constant 0 : i32
    %c0_i32_0 = arith.constant 0 : i32
    %c0_i32_1 = arith.constant 0 : i32
    %c0_i32_2 = arith.constant 0 : i32
    return %c0_i32, %c0_i32_0, %c0_i32_1 : i32, i32, i32
  }
  func.func @transform_5(%arg0: i32) -> (i32, i32, i32) {
    %c0_i32 = arith.constant 0 : i32
    %c0_i32_0 = arith.constant 0 : i32
    %c0_i32_1 = arith.constant 0 : i32
    %c0_i32_2 = arith.constant 0 : i32
    return %c0_i32, %c0_i32_0, %c0_i32_1 : i32, i32, i32
  }
}

module attributes {stable_mosaic.version = 11 : i64} {
  func.func @scr_head_kernel(%arg0: i32, %arg1: memref<16x128xf32, #tpu.memory_space<vmem>>, %arg2: memref<8x128xf32, #tpu.memory_space<vmem>>, %arg3: memref<1x1x16xf32, #tpu.memory_space<vmem>>, %arg4: memref<1x1x8xf32, #tpu.memory_space<vmem>>, %arg5: memref<1x4x1xi32, #tpu.memory_space<vmem>>, %arg6: memref<1x4x1xi32, #tpu.memory_space<vmem>>, %arg7: memref<1x4x1xf32, #tpu.memory_space<vmem>>, %arg8: memref<1x4x1xf32, #tpu.memory_space<vmem>>) attributes {dimension_semantics = [#tpu.dimension_semantics<parallel>], iteration_bounds = array<i64: 2>, scalar_prefetch = 0 : i64, scratch_operands = 0 : i64, tpu.core_type = #tpu.core_type<tc>, window_params = [{transform_indices = @transform_0, window_bounds = array<i64: 16, 128>}, {transform_indices = @transform_1, window_bounds = array<i64: 8, 128>}, {transform_indices = @transform_2, window_bounds = array<i64: 1, 1, 16>}, {transform_indices = @transform_3, window_bounds = array<i64: 1, 1, 8>}, {transform_indices = @transform_4, window_bounds = array<i64: 1, 4, 1>}, {transform_indices = @transform_5, window_bounds = array<i64: 1, 4, 1>}, {transform_indices = @transform_6, window_bounds = array<i64: 1, 4, 1>}, {transform_indices = @transform_7, window_bounds = array<i64: 1, 4, 1>}]} {
    %c0 = arith.constant 0 : index
    %c0_0 = arith.constant 0 : index
    %0 = vector.load %arg1[%c0, %c0_0] : memref<16x128xf32, #tpu.memory_space<vmem>>, vector<16x128xf32>
    %c0_1 = arith.constant 0 : index
    %c0_2 = arith.constant 0 : index
    %1 = vector.load %arg2[%c0_1, %c0_2] : memref<8x128xf32, #tpu.memory_space<vmem>>, vector<8x128xf32>
    %c0_3 = arith.constant 0 : index
    %c0_4 = arith.constant 0 : index
    %c0_5 = arith.constant 0 : index
    %2 = vector.load %arg3[%c0_3, %c0_4, %c0_5] : memref<1x1x16xf32, #tpu.memory_space<vmem>>, vector<1x1x16xf32>
    %3 = vector.shape_cast %2 : vector<1x1x16xf32> to vector<1x16xf32>
    %c0_6 = arith.constant 0 : index
    %c0_7 = arith.constant 0 : index
    %c0_8 = arith.constant 0 : index
    %4 = vector.load %arg4[%c0_6, %c0_7, %c0_8] : memref<1x1x8xf32, #tpu.memory_space<vmem>>, vector<1x1x8xf32>
    %5 = vector.shape_cast %4 : vector<1x1x8xf32> to vector<1x8xf32>
    %c0_9 = arith.constant 0 : index
    %c0_10 = arith.constant 0 : index
    %c0_11 = arith.constant 0 : index
    %6 = vector.load %arg5[%c0_9, %c0_10, %c0_11] : memref<1x4x1xi32, #tpu.memory_space<vmem>>, vector<1x4x1xi32>
    %7 = vector.shape_cast %6 : vector<1x4x1xi32> to vector<4x1xi32>
    %c0_12 = arith.constant 0 : index
    %c0_13 = arith.constant 0 : index
    %c0_14 = arith.constant 0 : index
    %8 = vector.load %arg6[%c0_12, %c0_13, %c0_14] : memref<1x4x1xi32, #tpu.memory_space<vmem>>, vector<1x4x1xi32>
    %9 = vector.shape_cast %8 : vector<1x4x1xi32> to vector<4x1xi32>
    %c0_15 = arith.constant 0 : index
    %c0_16 = arith.constant 0 : index
    %c0_17 = arith.constant 0 : index
    %10 = vector.load %arg7[%c0_15, %c0_16, %c0_17] : memref<1x4x1xf32, #tpu.memory_space<vmem>>, vector<1x4x1xf32>
    %11 = vector.shape_cast %10 : vector<1x4x1xf32> to vector<4x1xf32>
    %cst = arith.constant dense<0.000000e+00> : vector<1x128xf32>
    %12 = tpu.matmul %5, %1, %cst {dimension_numbers = #tpu.dot_dimension_numbers<[1], [0], [0], [1], [0, 0, 1, 1], [], []>} : vector<1x8xf32>, vector<8x128xf32>, vector<1x128xf32> -> vector<1x128xf32>
    %cst_18 = arith.constant dense<0.000000e+00> : vector<1xf32>
    %13 = vector.multi_reduction <add>, %5, %cst_18 [1] : vector<1x8xf32> to vector<1xf32>
    %14 = vector.shape_cast %13 : vector<1xf32> to vector<1x1xf32>
    %cst_19 = arith.constant 9.99999997E-7 : f32
    %15 = vector.broadcast %cst_19 : f32 to vector<1x1xf32>
    %16 = arith.addf %14, %15 : vector<1x1xf32>
    %17 = tpu.reciprocal %16 {approx = true} : vector<1x1xf32> -> vector<1x1xf32>
    %18 = vector.broadcast %17 : vector<1x1xf32> to vector<1x128xf32>
    %19 = arith.mulf %12, %18 : vector<1x128xf32>
    %cst_20 = arith.constant dense<0.000000e+00> : vector<1x16xf32>
    %20 = tpu.matmul %19, %0, %cst_20 {dimension_numbers = #tpu.dot_dimension_numbers<[1], [1], [0], [0], [0, 0, 1, 0], [], []>} : vector<1x128xf32>, vector<16x128xf32>, vector<1x16xf32> -> vector<1x16xf32>
    %cst_21 = arith.constant 0.000000e+00 : f32
    %21 = vector.broadcast %cst_21 : f32 to vector<1x16xf32>
    %22 = arith.cmpf ogt, %3, %21 : vector<1x16xf32>
    %cst_22 = arith.constant -1.000000e+30 : f32
    %23 = vector.broadcast %cst_22 : f32 to vector<1x16xf32>
    %24 = arith.select %22, %20, %23 : vector<1x16xi1>, vector<1x16xf32>
    %cst_23 = arith.constant dense<0xFF800000> : vector<1xf32>
    %25 = vector.multi_reduction <maximumf>, %24, %cst_23 [1] : vector<1x16xf32> to vector<1xf32>
    %26 = vector.shape_cast %25 : vector<1xf32> to vector<1x1xf32>
    %27 = vector.broadcast %26 : vector<1x1xf32> to vector<1x16xf32>
    %28 = arith.subf %24, %27 : vector<1x16xf32>
    %29 = math.exp %28 : vector<1x16xf32>
    %30 = arith.mulf %29, %3 : vector<1x16xf32>
    %cst_24 = arith.constant dense<0.000000e+00> : vector<1xf32>
    %31 = vector.multi_reduction <add>, %30, %cst_24 [1] : vector<1x16xf32> to vector<1xf32>
    %32 = vector.shape_cast %31 : vector<1xf32> to vector<1x1xf32>
    %cst_25 = arith.constant 9.99999997E-7 : f32
    %33 = vector.broadcast %cst_25 : f32 to vector<1x1xf32>
    %34 = arith.addf %32, %33 : vector<1x1xf32>
    %35 = tpu.reciprocal %34 {approx = true} : vector<1x1xf32> -> vector<1x1xf32>
    %36 = vector.broadcast %35 : vector<1x1xf32> to vector<1x16xf32>
    %37 = arith.mulf %30, %36 : vector<1x16xf32>
    %38 = tpu.iota {dimensions = array<i32: 1>} : vector<4x16xi32>
    %39 = vector.broadcast %7 : vector<4x1xi32> to vector<4x16xi32>
    %40 = arith.cmpi sge, %38, %39 : vector<4x16xi32>
    %41 = vector.broadcast %9 : vector<4x1xi32> to vector<4x16xi32>
    %42 = arith.cmpi sle, %38, %41 : vector<4x16xi32>
    %43 = arith.andi %40, %42 : vector<4x16xi1>
    %44 = arith.extui %43 : vector<4x16xi1> to vector<4x16xi32>
    %45 = arith.sitofp %44 : vector<4x16xi32> to vector<4x16xf32>
    %46 = vector.broadcast %3 : vector<1x16xf32> to vector<4x16xf32>
    %47 = arith.mulf %45, %46 : vector<4x16xf32>
    %48 = vector.broadcast %37 : vector<1x16xf32> to vector<4x16xf32>
    %49 = arith.mulf %47, %48 : vector<4x16xf32>
    %cst_26 = arith.constant dense<0.000000e+00> : vector<4x128xf32>
    %50 = tpu.matmul %49, %0, %cst_26 {dimension_numbers = #tpu.dot_dimension_numbers<[1], [0], [0], [1], [0, 0, 1, 1], [], []>} : vector<4x16xf32>, vector<16x128xf32>, vector<4x128xf32> -> vector<4x128xf32>
    %cst_27 = arith.constant dense<0.000000e+00> : vector<4x1xf32>
    %51 = tpu.matmul %50, %19, %cst_27 {dimension_numbers = #tpu.dot_dimension_numbers<[1], [1], [0], [0], [0, 0, 1, 0], [], []>} : vector<4x128xf32>, vector<1x128xf32>, vector<4x1xf32> -> vector<4x1xf32>
    %52 = arith.mulf %50, %50 : vector<4x128xf32>
    %cst_28 = arith.constant dense<0.000000e+00> : vector<4xf32>
    %53 = vector.multi_reduction <add>, %52, %cst_28 [1] : vector<4x128xf32> to vector<4xf32>
    %54 = vector.shape_cast %53 : vector<4xf32> to vector<4x1xf32>
    %cst_29 = arith.constant 9.99999997E-7 : f32
    %55 = vector.broadcast %cst_29 : f32 to vector<4x1xf32>
    %56 = arith.addf %54, %55 : vector<4x1xf32>
    %57 = math.sqrt %56 : vector<4x1xf32>
    %58 = arith.mulf %19, %19 : vector<1x128xf32>
    %cst_30 = arith.constant dense<0.000000e+00> : vector<1xf32>
    %59 = vector.multi_reduction <add>, %58, %cst_30 [1] : vector<1x128xf32> to vector<1xf32>
    %60 = vector.shape_cast %59 : vector<1xf32> to vector<1x1xf32>
    %cst_31 = arith.constant 9.99999997E-7 : f32
    %61 = vector.broadcast %cst_31 : f32 to vector<1x1xf32>
    %62 = arith.addf %60, %61 : vector<1x1xf32>
    %63 = math.sqrt %62 : vector<1x1xf32>
    %64 = vector.broadcast %63 : vector<1x1xf32> to vector<4x1xf32>
    %65 = arith.mulf %57, %64 : vector<4x1xf32>
    %66 = tpu.reciprocal %65 {approx = true} : vector<4x1xf32> -> vector<4x1xf32>
    %67 = arith.mulf %51, %66 : vector<4x1xf32>
    %68 = arith.addf %67, %11 : vector<4x1xf32>
    %cst_32 = arith.constant dense<0xFF800000> : vector<1xf32>
    %69 = vector.multi_reduction <maximumf>, %68, %cst_32 [0] : vector<4x1xf32> to vector<1xf32>
    %70 = vector.shape_cast %69 : vector<1xf32> to vector<1x1xf32>
    %71 = vector.broadcast %70 : vector<1x1xf32> to vector<4x1xf32>
    %72 = arith.subf %68, %71 : vector<4x1xf32>
    %73 = math.exp %72 : vector<4x1xf32>
    %cst_33 = arith.constant dense<0.000000e+00> : vector<1xf32>
    %74 = vector.multi_reduction <add>, %73, %cst_33 [0] : vector<4x1xf32> to vector<1xf32>
    %75 = vector.shape_cast %74 : vector<1xf32> to vector<1x1xf32>
    %76 = math.log %75 : vector<1x1xf32>
    %77 = vector.broadcast %70 : vector<1x1xf32> to vector<4x1xf32>
    %78 = arith.subf %68, %77 : vector<4x1xf32>
    %79 = vector.broadcast %76 : vector<1x1xf32> to vector<4x1xf32>
    %80 = arith.subf %78, %79 : vector<4x1xf32>
    %c0_34 = arith.constant 0 : index
    %c0_35 = arith.constant 0 : index
    %c0_36 = arith.constant 0 : index
    %81 = vector.load %arg8[%c0_34, %c0_35, %c0_36] : memref<1x4x1xf32, #tpu.memory_space<vmem>>, vector<1x4x1xf32>
    %82 = vector.shape_cast %81 : vector<1x4x1xf32> to vector<4x1xf32>
    %83 = vector.shape_cast %80 : vector<4x1xf32> to vector<1x4x1xf32>
    tpu.vector_store %arg8[%c0_34, %c0_35, %c0_36], %83 {strides = array<i32>} : memref<1x4x1xf32, #tpu.memory_space<vmem>>, vector<1x4x1xf32>,
    return
  }
  func.func @transform_0(%arg0: i32) -> (i32, i32) {
    %c0_i32 = arith.constant 0 : i32
    %c0_i32_0 = arith.constant 0 : i32
    return %c0_i32, %arg0 : i32, i32
  }
  func.func @transform_1(%arg0: i32) -> (i32, i32) {
    %c2_i32 = arith.constant 2 : i32
    %0 = arith.addi %c2_i32, %arg0 : i32
    %c0_i32 = arith.constant 0 : i32
    %c0_i32_0 = arith.constant 0 : i32
    return %c0_i32, %0 : i32, i32
  }
  func.func @transform_2(%arg0: i32) -> (i32, i32, i32) {
    %c0_i32 = arith.constant 0 : i32
    %c0_i32_0 = arith.constant 0 : i32
    %c0_i32_1 = arith.constant 0 : i32
    return %arg0, %c0_i32, %c0_i32_0 : i32, i32, i32
  }
  func.func @transform_3(%arg0: i32) -> (i32, i32, i32) {
    %c0_i32 = arith.constant 0 : i32
    %c0_i32_0 = arith.constant 0 : i32
    %c0_i32_1 = arith.constant 0 : i32
    return %arg0, %c0_i32, %c0_i32_0 : i32, i32, i32
  }
  func.func @transform_4(%arg0: i32) -> (i32, i32, i32) {
    %c0_i32 = arith.constant 0 : i32
    %c0_i32_0 = arith.constant 0 : i32
    %c0_i32_1 = arith.constant 0 : i32
    return %arg0, %c0_i32, %c0_i32_0 : i32, i32, i32
  }
  func.func @transform_5(%arg0: i32) -> (i32, i32, i32) {
    %c0_i32 = arith.constant 0 : i32
    %c0_i32_0 = arith.constant 0 : i32
    %c0_i32_1 = arith.constant 0 : i32
    return %arg0, %c0_i32, %c0_i32_0 : i32, i32, i32
  }
  func.func @transform_6(%arg0: i32) -> (i32, i32, i32) {
    %c0_i32 = arith.constant 0 : i32
    %c0_i32_0 = arith.constant 0 : i32
    %c0_i32_1 = arith.constant 0 : i32
    return %arg0, %c0_i32, %c0_i32_0 : i32, i32, i32
  }
  func.func @transform_7(%arg0: i32) -> (i32, i32, i32) {
    %c0_i32 = arith.constant 0 : i32
    %c0_i32_0 = arith.constant 0 : i32
    %c0_i32_1 = arith.constant 0 : i32
    return %arg0, %c0_i32, %c0_i32_0 : i32, i32, i32
  }
}

</mosaic_0001>

<bundles_post_ra>
// kernel: scr_forward.4
= control target key start
LH: loop header
LB: loop body
LE: loop exit
PB: predicated region body
PF: predicated region fallthrough
CT: control target
= control target key end

     0   :  { %s1852_s1 = inlined_call_operand.vmem [shape: bf16[640,128], index: 1, kind: input, shape index: {}]   ;;  %s1853_s0 = inlined_call_operand.vmem [shape: bf16[32,640], index: 0, kind: input, shape index: {}]   ;;  %s1854_s3 = inlined_call_operand.vmem [shape: bf16[128,128], index: 3, kind: input, shape index: {}]   ;;  %s1855_s5 = inlined_call_operand.vmem [shape: bf16[3,128,128], index: 5, kind: input, shape index: {}]   ;;  %s1856_s2 = inlined_call_operand.vmem [shape: f32[1,128], index: 2, kind: input, shape index: {}]   ;;  %s1857_s4 = inlined_call_operand.vmem [shape: f32[1,128], index: 4, kind: input, shape index: {}]   ;;  %s1858_s6 = inlined_call_operand.vmem [shape: f32[3,1,128], index: 6, kind: input, shape index: {}]   ;;  %s1859_s7 = inlined_call_operand.vmem [shape: f32[32,128], index: 7, kind: output, shape index: {0}]   ;;  %s1860_s8 = inlined_call_operand.vmem [shape: f32[32,128], index: 8, kind: output, shape index: {1}]   ;;  %s1861_s9 = inlined_call_operand.vmem [shape: f32[32,128], index: 9, kind: output, shape index: {2}]  }
   0x1   :  { %v1415_v0 = vld [vmem:[%s1852_s1 + $0x78] sm:$0xff]   ;;  %v1419_v4 = vld [vmem:[%s1852_s1 + $0x70] sm:$0xff]   ;;  %v1423_v8 = vld [vmem:[%s1852_s1 + $0x68] sm:$0xff]  }
   0x2   :  { %v1416_v1 = vld [vmem:[%s1852_s1 + $0x38] sm:$0xff]   ;;  %1209 = vmatprep.subr.bf16.mxu0 %v1415_v0  ;;  %v1420_v5 = vld [vmem:[%s1852_s1 + $0x30] sm:$0xff]   ;;  %v1424_v9 = vld [vmem:[%s1852_s1 + $0x28] sm:$0xff]  }
   0x3   :  { %v1417_v2 = vld [vmem:[%s1852_s1 + $0xf8] sm:$0xff]   ;;  %1210 = vmatpush3.bf16.msra.mxu0 %v1416_v1  ;;  %v1421_v6 = vld [vmem:[%s1852_s1 + $0xf0] sm:$0xff]   ;;  %v1425_v10 = vld [vmem:[%s1852_s1 + $0xe8] sm:$0xff]  }
   0x4   :  { %v1418_v3 = vld [vmem:[%s1852_s1 + $0xb8] sm:$0xff]   ;;  %1237 = vmatprep.subr.bf16.mxu1 %v1417_v2  ;;  %1211 = vmatprep.subr.bf16.mxu0 %v1419_v4  ;;  %v1422_v7 = vld [vmem:[%s1852_s1 + $0xb0] sm:$0xff]   ;;  %v1426_v11 = vld [vmem:[%s1852_s1 + $0xa8] sm:$0xff]  }
   0x5   :  { %1238 = vmatpush3.bf16.msra.mxu1 %v1418_v3  ;;  %v1427_v12 = vld [vmem:[%s1852_s1 + $0x60] sm:$0xff]   ;;  %v1431_v16 = vld [vmem:[%s1852_s1 + $0x58] sm:$0xff]   ;;  %v1435_v20 = vld [vmem:[%s1852_s1 + $0x50] sm:$0xff]  }
   0x6   :  { %1239 = vmatprep.subr.bf16.mxu1 %v1421_v6  ;;  %v1428_v13 = vld [vmem:[%s1852_s1 + $0x20] sm:$0xff]   ;;  %v1432_v17 = vld [vmem:[%s1852_s1 + $0x18] sm:$0xff]   ;;  %v1436_v21 = vld [vmem:[%s1852_s1 + $0x10] sm:$0xff]  }
   0x7   :  { %1212 = vmatpush3.bf16.msra.mxu0 %v1420_v5  ;;  %v1429_v14 = vld [vmem:[%s1852_s1 + $0xe0] sm:$0xff]   ;;  %v1433_v18 = vld [vmem:[%s1852_s1 + $0xd8] sm:$0xff]   ;;  %v1437_v22 = vld [vmem:[%s1852_s1 + $0xd0] sm:$0xff]  }
   0x8   :  { %1213 = vmatprep.subr.bf16.mxu0 %v1423_v8  ;;  %v1430_v15 = vld [vmem:[%s1852_s1 + $0xa0] sm:$0xff]   ;;  %v1434_v19 = vld [vmem:[%s1852_s1 + $0x98] sm:$0xff]   ;;  %v1438_v23 = vld [vmem:[%s1852_s1 + $0x90] sm:$0xff]  }
   0x9   :  { %1240 = vmatpush3.bf16.msra.mxu1 %v1422_v7  ;;  %v1439_v24 = vld [vmem:[%s1852_s1 + $0x48] sm:$0xff]   ;;  %v1443_v28 = vld [vmem:[%s1852_s1 + $0x40] sm:$0xff]   ;;  %v1450_v34 = vld [vmem:[%s1852_s1 + $0x138] sm:$0xff]  }
   0xa   :  { %1241 = vmatprep.subr.bf16.mxu1 %v1425_v10  ;;  %v1440_v25 = vld [vmem:[%s1852_s1 + $0x8] sm:$0xff]   ;;  %v1444_v29 = vld [vmem:[%s1852_s1] sm:$0xff]   ;;  %v1454_v37 = vld [vmem:[%s1852_s1 + $0x130] sm:$0xff]  }
   0xb   :  { %1214 = vmatpush3.bf16.msra.mxu0 %v1424_v9  ;;  %v1441_v26 = vld [vmem:[%s1852_s1 + $0xc8] sm:$0xff]   ;;  %v1445_v30 = vld [vmem:[%s1852_s1 + $0xc0] sm:$0xff]   ;;  %v1457_v44 = vld [vmem:[%s1852_s1 + $0x118] sm:$0xff]  }
   0xc   :  { %1215 = vmatprep.subr.bf16.mxu0 %v1427_v12  ;;  %v1442_v27 = vld [vmem:[%s1852_s1 + $0x88] sm:$0xff]   ;;  %v1446_v31 = vld [vmem:[%s1853_s0] ss:$20 sps:$4 sm:$0xff]   ;;  %v1448_v32 = vld [vmem:[%s1853_s0 + $0x4] ss:$20 sps:$4 sm:$0xff]  }
   0xd   :  { %1242 = vmatpush3.bf16.msra.mxu1 %v1426_v11  ;;  %v1449_v33 = vld [vmem:[%s1852_s1 + $0x80] sm:$0xff]   ;;  %453 = vmatprep.mubr.bf16.mxu0 %v1448_v32  ;;  %v1451_v35 = vld [vmem:[%s1853_s0 + $0x8] ss:$20 sps:$4 sm:$0xff]   ;;  %v1464_v46 = vld [vmem:[%s1852_s1 + $0x110] sm:$0xff]  }
   0xe   :  { %1243 = vmatprep.subr.bf16.mxu1 %v1429_v14  ;;  %v1453_v36 = vld [vmem:[%s1853_s0 + $0xc] ss:$20 sps:$4 sm:$0xff]   ;;  %v1460_v41 = vld [vmem:[%s1853_s0 + $0x28] ss:$20 sps:$4 sm:$0xff]   ;;  %v1463_v43 = vld [vmem:[%s1853_s0 + $0x30] ss:$20 sps:$4 sm:$0xff]  }
   0xf   :  { %1216 = vmatpush3.bf16.msra.mxu0 %v1428_v13  ;;  %502 = vmatprep.mubr.bf16.mxu1 %v1453_v36  ;;  %v1455_v38 = vld [vmem:[%s1852_s1 + $0x128] sm:$0xff]   ;;  %v1456_v39 = vld [vmem:[%s1852_s1 + $0x120] sm:$0xff]   ;;  %v1469_v50 = vld [vmem:[%s1854_s3 + $0x38] sm:$0xff]  }
  0x10   :  { %1217 = vmatprep.subr.bf16.mxu0 %v1431_v16  ;;  %v1458_v40 = vld [vmem:[%s1853_s0 + $0x2c] ss:$20 sps:$4 sm:$0xff]   ;;  %v1461_v42 = vld [vmem:[%s1853_s0 + $0x34] ss:$20 sps:$4 sm:$0xff]   ;;  %v1467_v45 = vld [vmem:[%s1853_s0 + $0x10] ss:$20 sps:$4 sm:$0xff]  }
  0x11   :  { %1244 = vmatpush3.bf16.msra.mxu1 %v1430_v15  ;;  %v1465_v47 = vld [vmem:[%s1852_s1 + $0x108] sm:$0xff]   ;;  %v1466_v48 = vld [vmem:[%s1852_s1 + $0x100] sm:$0xff]   ;;  %v1470_v51 = vld [vmem:[%s1854_s3 + $0x30] sm:$0xff]  }
  0x12   :  { %1245 = vmatprep.subr.bf16.mxu1 %v1433_v18  ;;  %v1468_v49 = vld [vmem:[%s1853_s0 + $0x38] ss:$20 sps:$4 sm:$0xff]   ;;  %v1472_v53 = vld [vmem:[%s1854_s3 + $0x20] sm:$0xff]   ;;  %v1474_v55 = vld [vmem:[%s1854_s3 + $0x10] sm:$0xff]  }
  0x13   :  { %1218 = vmatpush3.bf16.msra.mxu0 %v1432_v17  ;;  %v1471_v52 = vld [vmem:[%s1854_s3 + $0x28] sm:$0xff]   ;;  %v1473_v54 = vld [vmem:[%s1854_s3 + $0x18] sm:$0xff]   ;;  %v1476_v57 = vld [vmem:[%s1854_s3] sm:$0xff]  }
  0x14   :  { %1219 = vmatprep.subr.bf16.mxu0 %v1435_v20  ;;  %v1475_v56 = vld [vmem:[%s1854_s3 + $0x8] sm:$0xff]   ;;  %v1477_v58 = vld [vmem:[%s1855_s5 + $0x38] sm:$0xff]   ;;  %v1479_v60 = vld [vmem:[%s1855_s5 + $0x30] sm:$0xff]  }
  0x15   :  { %1246 = vmatpush3.bf16.msra.mxu1 %v1434_v19  ;;  %v1731_v59 = vld [vmem:[%s1855_s5 + $0x78] sm:$0xff]   ;;  %v1481_v61 = vld [vmem:[%s1855_s5 + $0x28] sm:$0xff]   ;;  %v1483_v62 = vld [vmem:[%s1855_s5 + $0x20] sm:$0xff]  }
  0x16   :  { %1247 = vmatprep.subr.bf16.mxu1 %v1437_v22  ;;  %v1485_v63 = vld [vmem:[%s1855_s5 + $0x18] sm:$0xff]   ;;  %v1088_v17 = vld [vmem:[%s1856_s2] ss:$0 sm:$0xff] }
  0x17   :  { %1220 = vmatpush3.bf16.msra.mxu0 %v1436_v21 }
  0x18   :  { %1221 = vmatprep.subr.bf16.mxu0 %v1439_v24 }
  0x19   :  { %1248 = vmatpush3.bf16.msra.mxu1 %v1438_v23 }
  0x1a   :  { %1249 = vmatprep.subr.bf16.mxu1 %v1441_v26 }
  0x1b   :  { %1222 = vmatpush3.bf16.msra.mxu0 %v1440_v25 }
  0x1c   :  { %1223 = vmatprep.subr.bf16.mxu0 %v1443_v28 }
  0x1d   :  { %1250 = vmatpush3.bf16.msra.mxu1 %v1442_v27 }
  0x1e   :  { %1251 = vmatprep.subr.bf16.mxu1 %v1445_v30 }
  0x1f   :  { %1224 = vmatpush3.bf16.msra.mxu0 %v1444_v29 }
  0x20   :  { %1315 = vmatprep.subr.bf16.mxu0 %v1450_v34 }
  0x21   :  { %1252 = vmatpush3.bf16.msra.mxu1 %v1449_v33 }
  0x22   :  { %454 = vmatmul.mubr.bf16.vlgmr.msra.gmra.mxu0 %v1446_v31  ;;  %1335 = vmatprep.subr.bf16.mxu1 %v1469_v50 }
  0x23   :  { %1316 = vmatpush3.bf16.msra.mxu0 %v1450_v34  ;;  %461 = vmatprep.mubr.bf16.mxu0 %v1458_v40 }
  0x24   :  { %503 = vmatmul.mubr.bf16.vlgmr.msra.gmra.mxu1 %v1451_v35  ;;  %1317 = vmatprep.subr.bf16.mxu0 %v1454_v37 }
  0x25   :  { %510 = vmatprep.mubr.bf16.mxu1 %v1461_v42  ;;  %1336 = vmatpush3.bf16.msra.mxu1 %v1469_v50  ;;  %v1486_v50 = vld [vmem:[%s1855_s5 + $0x58] sm:$0xff]  }
  0x26   :  { %1337 = vmatprep.subr.bf16.mxu1 %v1470_v51 }
  0x27   :  { %1318 = vmatpush3.bf16.msra.mxu0 %v1454_v37 }
  0x28   :  { %1319 = vmatprep.subr.bf16.mxu0 %v1455_v38 }
  0x29   :  { %1338 = vmatpush3.bf16.msra.mxu1 %v1470_v51  ;;  %v1487_v51 = vld [vmem:[%s1855_s5 + $0x10] sm:$0xff]  }
  0x2a   :  { %462 = vmatmul.mubr.bf16.gmra.mxu0 %v1460_v41  ;;  %1339 = vmatprep.subr.bf16.mxu1 %v1471_v52 }
  0x2b   :  { %1320 = vmatpush3.bf16.msra.mxu0 %v1455_v38  ;;  %1331 = vmatprep.mubr.bf16.mxu0 %v1467_v45 }
  0x2c   :  { %1321 = vmatprep.subr.bf16.mxu0 %v1456_v39  ;;  %511 = vmatmul.mubr.bf16.gmra.mxu1 %v1463_v43 }
  0x2d   :  { %1340 = vmatpush3.bf16.msra.mxu1 %v1471_v52  ;;  %v1488_v52 = vld [vmem:[%s1855_s5 + $0x50] sm:$0xff]  }
  0x2e   :  { %1341 = vmatprep.subr.bf16.mxu1 %v1472_v53 }
  0x2f   :  { %1322 = vmatpush3.bf16.msra.mxu0 %v1456_v39 }
  0x30   :  { %1323 = vmatprep.subr.bf16.mxu0 %v1457_v44 }
  0x31   :  { %1342 = vmatpush3.bf16.msra.mxu1 %v1472_v53  ;;  %v1489_v53 = vld [vmem:[%s1855_s5 + $0x8] sm:$0xff]  }
  0x32   :  { %1343 = vmatprep.subr.bf16.mxu1 %v1473_v54 }
  0x33   :  { %1324 = vmatpush3.bf16.msra.mxu0 %v1457_v44 }
  0x34   :  { %1325 = vmatprep.subr.bf16.mxu0 %v1464_v46 }
  0x35   :  { %1344 = vmatpush3.bf16.msra.mxu1 %v1473_v54  ;;  %v1490_v54 = vld [vmem:[%s1855_s5 + $0x48] sm:$0xff]  }
  0x36   :  { %1345 = vmatprep.subr.bf16.mxu1 %v1474_v55 }
  0x37   :  { %1326 = vmatpush3.bf16.msra.mxu0 %v1464_v46 }
  0x38   :  { %1327 = vmatprep.subr.bf16.mxu0 %v1465_v47 }
  0x39   :  { %1346 = vmatpush3.bf16.msra.mxu1 %v1474_v55  ;;  %v1491_v55 = vld [vmem:[%s1855_s5] sm:$0xff]  }
  0x3a   :  { %1347 = vmatprep.subr.bf16.mxu1 %v1475_v56 }
  0x3b   :  { %1328 = vmatpush3.bf16.msra.mxu0 %v1465_v47  ;;  %v1480_v47 = vld [vmem:[%s1855_s5 + $0x70] sm:$0xff]  }
  0x3c   :  { %1329 = vmatprep.subr.bf16.mxu0 %v1466_v48 }
  0x3d   :  { %1348 = vmatpush3.bf16.msra.mxu1 %v1475_v56  ;;  %v1492_v56 = vld [vmem:[%s1855_s5 + $0x40] sm:$0xff]  }
  0x3e   :  { %1349 = vmatprep.subr.bf16.mxu1 %v1476_v57 }
  0x3f   :  { %1330 = vmatpush3.bf16.msra.mxu0 %v1466_v48  ;;  %v1482_v48 = vld [vmem:[%s1855_s5 + $0x68] sm:$0xff]  }
  0x40   :  { %1355 = vmatprep.subr.bf16.mxu0 %v1477_v58 }
  0x41   :  { %1350 = vmatpush3.bf16.msra.mxu1 %v1476_v57  ;;  %v1493_v57 = vld [vmem:[%s1855_s5 + $0xb8] sm:$0xff]  }
  0x42   :  { %1332 = vmatmul.mubr.bf16.vlgmr.msra.gmra.mxu0 %v1468_v49  ;;  %1375 = vmatprep.subr.bf16.mxu1 %v1731_v59  ;;  %v1484_v49 = vld [vmem:[%s1855_s5 + $0x60] sm:$0xff]  }
  0x43   :  { %1356 = vmatpush3.bf16.msra.mxu0 %v1477_v58 }
  0x44   :  { %1357 = vmatprep.subr.bf16.mxu0 %v1479_v60 }
  0x47   :  { %1358 = vmatpush3.bf16.msra.mxu0 %v1479_v60  ;;  %v1139_v60 = vld [vmem:[%s1857_s4] ss:$0 sm:$0xff] }
  0x48   :  { %1359 = vmatprep.subr.bf16.mxu0 %v1481_v61 }
  0x4b   :  { %1360 = vmatpush3.bf16.msra.mxu0 %v1481_v61 }
  0x4c   :  { %1361 = vmatprep.subr.bf16.mxu0 %v1483_v62 }
  0x4f   :  { %1362 = vmatpush3.bf16.msra.mxu0 %v1483_v62 }
  0x50   :  { %1363 = vmatprep.subr.bf16.mxu0 %v1485_v63 }
  0x53   :  { %1364 = vmatpush3.bf16.msra.mxu0 %v1485_v63 }
  0x54   :  { %1365 = vmatprep.subr.bf16.mxu0 %v1487_v51 }
  0x57   :  { %1366 = vmatpush3.bf16.msra.mxu0 %v1487_v51 }
  0x58   :  { %1367 = vmatprep.subr.bf16.mxu0 %v1489_v53 }
  0x5b   :  { %1368 = vmatpush3.bf16.msra.mxu0 %v1489_v53 }
  0x5c   :  { %1369 = vmatprep.subr.bf16.mxu0 %v1491_v55 }
  0x5f   :  { %1370 = vmatpush3.bf16.msra.mxu0 %v1491_v55 }
  0x60   :  { %1395 = vmatprep.subr.bf16.mxu0 %v1493_v57 }
  0xe2   :  { %v1225_v0 = vpop.f32.mrf.mxu0 }
  0xe4   :  { %v1226_v1 = vpop.f32.mrf.mxu0  ;;  %v1253_v2 = vpop.f32.mrf.mxu1 }
  0xe5   :  { %v1227_v15 = vadd.f32 %v1226_v1, %v1225_v0 }
  0xe6   :  { %v1228_v3 = vpop.f32.mrf.mxu0  ;;  %v1254_v4 = vpop.f32.mrf.mxu1 }
  0xe7   :  { %v456_v21 = vadd.f32 %v1227_v15, %v1088_v17  ;;  %v1255_v22 = vadd.f32 %v1254_v4, %v1253_v2  ;;  %v1500_v15 = vld [vmem:[%s1855_s5 + $0x80] sm:$0xff]  }
  0xe8   :  { %v1229_v5 = vpop.f32.mrf.mxu0  ;;  %v1256_v6 = vpop.f32.mrf.mxu1 }
  0xe9   :  { %v1230_v20 = vadd.f32 %v1229_v5, %v1228_v3  ;;  %v505_v31 = vadd.f32 %v1255_v22, %v456_v21 }
  0xea   :  { %v1231_v7 = vpop.f32.mrf.mxu0  ;;  %v1257_v8 = vpop.f32.mrf.mxu1 }
  0xeb   :  { %v459_v28 = vadd.f32 %v1230_v20, %v1088_v17  ;;  %v1258_v29 = vadd.f32 %v1257_v8, %v1256_v6 }
  0xec   :  { %v1232_v9 = vpop.f32.mrf.mxu0  ;;  %v1259_v10 = vpop.f32.mrf.mxu1 }
  0xed   :  { %v1233_v18 = vadd.f32 %v1232_v9, %v1231_v7  ;;  %v508_v37 = vadd.f32 %v1258_v29, %v459_v28  ;;  %v1494_v9 = vld [vmem:[%s1855_s5 + $0xb0] sm:$0xff]  }
  0xee   :  { %v1234_v11 = vpop.f32.mrf.mxu0  ;;  %v1260_v12 = vpop.f32.mrf.mxu1 }
  0xef   :  { %v464_v25 = vadd.f32 %v1233_v18, %v1088_v17  ;;  %v1261_v26 = vadd.f32 %v1260_v12, %v1259_v10  ;;  %v1495_v10 = vld [vmem:[%s1855_s5 + $0xa8] sm:$0xff]   ;;  %v1497_v12 = vld [vmem:[%s1855_s5 + $0x98] sm:$0xff]  }
  0xf0   :  { %v1235_v13 = vpop.f32.mrf.mxu0  ;;  %v1262_v14 = vpop.f32.mrf.mxu1 }
  0xf1   :  { %v1236_v16 = vadd.f32 %v1235_v13, %v1234_v11  ;;  %v513_v33 = vadd.f32 %v1261_v26, %v464_v25  ;;  %v1496_v11 = vld [vmem:[%s1855_s5 + $0xa0] sm:$0xff]   ;;  %v1498_v13 = vld [vmem:[%s1855_s5 + $0x90] sm:$0xff]  }
  0xf2   :  { %v1263_v19 = vpop.f32.mrf.mxu1 }
  0xf3   :  { %v467_v23 = vadd.f32 %v1236_v16, %v1088_v17  ;;  %v1264_v24 = vadd.f32 %v1263_v19, %v1262_v14  ;;  %v1499_v14 = vld [vmem:[%s1855_s5 + $0x88] sm:$0xff]   ;;  %v1148_v16 = vld [vmem:[%s1858_s6] ss:$0 sm:$0xff]  ;;  %v1174_v17 = vld [vmem:[%s1858_s6 + $0x1] ss:$0 sm:$0xff] }
  0xf5   :  { %v516_v32 = vadd.f32 %v1264_v24, %v467_v23 }
 0x102   :  { %v1333_v27 = vpop.f32.mrf.mxu0 }
 0x103   :  { %v562_v38 = vadd.f32 %v1333_v27, %v513_v33 }
 0x104   :  { %v553_v30 = vpop.f32.mrf.mxu0 }
 0x105   :  { %v554_v35 = vadd.f32 %v553_v30, %v505_v31  ;;  %v570_v44 = vmax.f32 %v562_v38, 0.0 }
 0x106   :  { %v1334_v34 = vpop.f32.mrf.mxu0 }
 0x107   :  { %v565_v36 = vadd.f32 %v1334_v34, %v516_v32  ;;  %v568_v42 = vmax.f32 %v554_v35, 0.0  ;;  %v1200_v34 = vld [vmem:[%s1858_s6 + $0x2] ss:$0 sm:$0xff] }
 0x108   :  { %v556_v39 = vpop.f32.mrf.mxu0 }
 0x109   :  { %v557_v40 = vadd.f32 %v556_v39, %v508_v37  ;;  %v571_v41 = vmax.f32 %v565_v36, 0.0 }
 0x10b   :  { %v569_v43 = vmax.f32 %v557_v40, 0.0  ;;  %v573_v46 = vpack.c.bf16 %v571_v41, %v570_v44 }
 0x10d   :  { %v572_v45 = vpack.c.bf16 %v569_v43, %v568_v42 }
 0x10f   :  { %1351 = vmatprep.mubr.bf16.mxu1 %v572_v45 }
 0x110   :  { %1352 = vmatmul.mubr.bf16.vlgmr.msra.gmra.mxu1 %v573_v46 }
 0x111   :  { %1376 = vmatpush3.bf16.msra.mxu1 %v1731_v59 }
 0x112   :  { %1377 = vmatprep.subr.bf16.mxu1 %v1480_v47 }
 0x115   :  { %1378 = vmatpush3.bf16.msra.mxu1 %v1480_v47 }
 0x116   :  { %1379 = vmatprep.subr.bf16.mxu1 %v1482_v48 }
 0x119   :  { %1380 = vmatpush3.bf16.msra.mxu1 %v1482_v48 }
 0x11a   :  { %1381 = vmatprep.subr.bf16.mxu1 %v1484_v49 }
 0x11d   :  { %1382 = vmatpush3.bf16.msra.mxu1 %v1484_v49 }
 0x11e   :  { %1383 = vmatprep.subr.bf16.mxu1 %v1486_v50 }
 0x121   :  { %1384 = vmatpush3.bf16.msra.mxu1 %v1486_v50 }
 0x122   :  { %1385 = vmatprep.subr.bf16.mxu1 %v1488_v52 }
 0x125   :  { %1386 = vmatpush3.bf16.msra.mxu1 %v1488_v52 }
 0x126   :  { %1387 = vmatprep.subr.bf16.mxu1 %v1490_v54 }
 0x129   :  { %1388 = vmatpush3.bf16.msra.mxu1 %v1490_v54 }
 0x12a   :  { %1389 = vmatprep.subr.bf16.mxu1 %v1492_v56 }
 0x12d   :  { %1390 = vmatpush3.bf16.msra.mxu1 %v1492_v56 }
 0x1d0   :  { %v1353_v58 = vpop.f32.mrf.mxu1 }
 0x1d1   :  { %v688_v0 = vadd.f32 %v1353_v58, %v1139_v60 }
 0x1d2   :  { %v679_v59 = vpop.f32.mrf.mxu1 }
 0x1d3   :  { %v680_v62 = vadd.f32 %v1139_v60, %v679_v59  ;;  %v696_v6 = vmax.f32 %v688_v0, 0.0 }
 0x1d4   :  { %v1354_v61 = vpop.f32.mrf.mxu1 }
 0x1d5   :  { %v691_v63 = vadd.f32 %v1354_v61, %v1139_v60  ;;  %v694_v4 = vmax.f32 %v680_v62, 0.0 }
 0x1d6   :  { %v682_v1 = vpop.f32.mrf.mxu1 }
 0x1d7   :  { %v683_v2 = vadd.f32 %v1139_v60, %v682_v1  ;;  %v697_v3 = vmax.f32 %v691_v63, 0.0 }
 0x1d9   :  { %v695_v5 = vmax.f32 %v683_v2, 0.0  ;;  %v699_v8 = vpack.c.bf16 %v697_v3, %v696_v6 }
 0x1db   :  { %v698_v7 = vpack.c.bf16 %v695_v5, %v694_v4 }
 0x1dd   :  { %1371 = vmatprep.mubr.bf16.mxu0 %v698_v7  ;;  %1391 = vmatprep.mubr.bf16.mxu1 %v698_v7 }
 0x1de   :  { %1372 = vmatmul.mubr.bf16.vlgmr.msra.gmra.mxu0 %v699_v8  ;;  %1392 = vmatmul.mubr.bf16.vlgmr.msra.gmra.mxu1 %v699_v8 }
 0x1df   :  { %1396 = vmatpush3.bf16.msra.mxu0 %v1493_v57  ;;  %1411 = vmatprep.mubr.bf16.mxu0 %v698_v7 }
 0x1e0   :  { %1397 = vmatprep.subr.bf16.mxu0 %v1494_v9 }
 0x1e3   :  { %1398 = vmatpush3.bf16.msra.mxu0 %v1494_v9 }
 0x1e4   :  { %1399 = vmatprep.subr.bf16.mxu0 %v1495_v10 }
 0x1e7   :  { %1400 = vmatpush3.bf16.msra.mxu0 %v1495_v10 }
 0x1e8   :  { %1401 = vmatprep.subr.bf16.mxu0 %v1496_v11 }
 0x1eb   :  { %1402 = vmatpush3.bf16.msra.mxu0 %v1496_v11 }
 0x1ec   :  { %1403 = vmatprep.subr.bf16.mxu0 %v1497_v12 }
 0x1ef   :  { %1404 = vmatpush3.bf16.msra.mxu0 %v1497_v12 }
 0x1f0   :  { %1405 = vmatprep.subr.bf16.mxu0 %v1498_v13 }
 0x1f3   :  { %1406 = vmatpush3.bf16.msra.mxu0 %v1498_v13 }
 0x1f4   :  { %1407 = vmatprep.subr.bf16.mxu0 %v1499_v14 }
 0x1f7   :  { %1408 = vmatpush3.bf16.msra.mxu0 %v1499_v14 }
 0x1f8   :  { %1409 = vmatprep.subr.bf16.mxu0 %v1500_v15 }
 0x1fb   :  { %1410 = vmatpush3.bf16.msra.mxu0 %v1500_v15 }
 0x1fe   :  { %1412 = vmatmul.mubr.bf16.vlgmr.msra.gmra.mxu0 %v699_v8 }
 0x29e   :  { %v1373_v18 = vpop.f32.mrf.mxu0  ;;  %v1393_v19 = vpop.f32.mrf.mxu1 }
 0x29f   :  { %v814_v20 = vadd.f32 %v1373_v18, %v1148_v16  ;;  %v940_v21 = vadd.f32 %v1393_v19, %v1174_v17 }
 0x2a0   :  { %v805_v22 = vpop.f32.mrf.mxu0  ;;  %v931_v23 = vpop.f32.mrf.mxu1 }
 0x2a1   :  { %822 = vst [vmem:[%s1859_s7 + $0x10] sm:$0xff] %v814_v20  ;;  %948 = vst [vmem:[%s1860_s8 + $0x10] sm:$0xff] %v940_v21  ;;  %v806_v24 = vadd.f32 %v1148_v16, %v805_v22  ;;  %v932_v25 = vadd.f32 %v1174_v17, %v931_v23 }
 0x2a2   :  { %v1374_v26 = vpop.f32.mrf.mxu0  ;;  %v1394_v27 = vpop.f32.mrf.mxu1 }
 0x2a3   :  { %820 = vst [vmem:[%s1859_s7] sm:$0xff] %v806_v24  ;;  %946 = vst [vmem:[%s1860_s8] sm:$0xff] %v932_v25  ;;  %v817_v28 = vadd.f32 %v1374_v26, %v1148_v16  ;;  %v943_v29 = vadd.f32 %v1394_v27, %v1174_v17 }
 0x2a4   :  { %v808_v30 = vpop.f32.mrf.mxu0  ;;  %v934_v31 = vpop.f32.mrf.mxu1 }
 0x2a5   :  { %823 = vst [vmem:[%s1859_s7 + $0x18] sm:$0xff] %v817_v28  ;;  %949 = vst [vmem:[%s1860_s8 + $0x18] sm:$0xff] %v943_v29  ;;  %v809_v32 = vadd.f32 %v1148_v16, %v808_v30  ;;  %v935_v33 = vadd.f32 %v1174_v17, %v934_v31 }
 0x2a7   :  { %821 = vst [vmem:[%s1859_s7 + $0x8] sm:$0xff] %v809_v32  ;;  %947 = vst [vmem:[%s1860_s8 + $0x8] sm:$0xff] %v935_v33 }
 0x2be   :  { %v1413_v35 = vpop.f32.mrf.mxu0 }
 0x2bf   :  { %v1066_v36 = vadd.f32 %v1413_v35, %v1200_v34 }
 0x2c0   :  { %v1057_v37 = vpop.f32.mrf.mxu0 }
 0x2c1   :  { %1074 = vst [vmem:[%s1861_s9 + $0x10] sm:$0xff] %v1066_v36  ;;  %v1058_v38 = vadd.f32 %v1200_v34, %v1057_v37 }
 0x2c2   :  { %v1414_v39 = vpop.f32.mrf.mxu0 }
 0x2c3   :  { %1072 = vst [vmem:[%s1861_s9] sm:$0xff] %v1058_v38  ;;  %v1069_v40 = vadd.f32 %v1414_v39, %v1200_v34 }
 0x2c4   :  { %v1060_v41 = vpop.f32.mrf.mxu0 }
 0x2c5   :  { %1075 = vst [vmem:[%s1861_s9 + $0x18] sm:$0xff] %v1069_v40  ;;  %v1061_v42 = vadd.f32 %v1200_v34, %v1060_v41 }
 0x2c7   :  { %1073 = vst [vmem:[%s1861_s9 + $0x8] sm:$0xff] %v1061_v42 }

// kernel: scr_forward.6
= control target key start
LH: loop header
LB: loop body
LE: loop exit
PB: predicated region body
PF: predicated region fallthrough
CT: control target
= control target key end

     0   :  { %v865_v48 = vmov 0.0   ;;  %s867_s14 = smov 0   ;;  %s1007_s0 = inlined_call_operand.vmem [shape: f32[16,8,128], index: 0, kind: input, shape index: {}]   ;;  %s1008_s1 = inlined_call_operand.vmem [shape: f32[16,8,128], index: 1, kind: input, shape index: {}]   ;;  %s1009_s2 = inlined_call_operand.vmem [shape: f32[16,8,128], index: 2, kind: input, shape index: {}]   ;;  %s1010_s3 = inlined_call_operand.vmem [shape: f32[16,8,1], index: 3, kind: input, shape index: {}]   ;;  %s1011_s4 = inlined_call_operand.vmem [shape: f32[3,128,128], index: 4, kind: input, shape index: {}]   ;;  %s1012_s5 = inlined_call_operand.vmem [shape: f32[16,8,128], index: 5, kind: output, shape index: {}]  }
   0x1   :  { %v628_v0 = vld [vmem:[%s1011_s4] sm:$0xff]  ;;  %v633_v1 = vld [vmem:[%s1011_s4 + $0x8] sm:$0xff]  ;;  %v638_v2 = vld [vmem:[%s1011_s4 + $0x10] sm:$0xff] }
   0x2   :  { %1013 = vst [vmem:[#allocation2_spill] sm:$0xff] %v628_v0  ;;  %1014 = vst [vmem:[#allocation3_spill] sm:$0xff] %v633_v1  ;;  %v643_v3 = vld [vmem:[%s1011_s4 + $0x18] sm:$0xff]  ;;  %v648_v4 = vld [vmem:[%s1011_s4 + $0x20] sm:$0xff] }
   0x3   :  { %v653_v5 = vld [vmem:[%s1011_s4 + $0x28] sm:$0xff]  ;;  %v658_v6 = vld [vmem:[%s1011_s4 + $0x30] sm:$0xff]  ;;  %v663_v7 = vld [vmem:[%s1011_s4 + $0x38] sm:$0xff] }
   0x4   :  { %v668_v8 = vld [vmem:[%s1011_s4 + $0x40] sm:$0xff]  ;;  %v673_v9 = vld [vmem:[%s1011_s4 + $0x48] sm:$0xff]  ;;  %v678_v10 = vld [vmem:[%s1011_s4 + $0x50] sm:$0xff] }
   0x5   :  { %v683_v11 = vld [vmem:[%s1011_s4 + $0x58] sm:$0xff]  ;;  %v688_v12 = vld [vmem:[%s1011_s4 + $0x60] sm:$0xff]  ;;  %v693_v13 = vld [vmem:[%s1011_s4 + $0x68] sm:$0xff] }
   0x6   :  { %v698_v14 = vld [vmem:[%s1011_s4 + $0x70] sm:$0xff]  ;;  %v703_v15 = vld [vmem:[%s1011_s4 + $0x78] sm:$0xff]  ;;  %v708_v16 = vld [vmem:[%s1011_s4 + $0x80] sm:$0xff] }
   0x7   :  { %v713_v17 = vld [vmem:[%s1011_s4 + $0x88] sm:$0xff]  ;;  %v718_v18 = vld [vmem:[%s1011_s4 + $0x90] sm:$0xff]  ;;  %v723_v19 = vld [vmem:[%s1011_s4 + $0x98] sm:$0xff] }
   0x8   :  { %v728_v20 = vld [vmem:[%s1011_s4 + $0xa0] sm:$0xff]  ;;  %v733_v21 = vld [vmem:[%s1011_s4 + $0xa8] sm:$0xff]  ;;  %v738_v22 = vld [vmem:[%s1011_s4 + $0xb0] sm:$0xff] }
   0x9   :  { %v743_v23 = vld [vmem:[%s1011_s4 + $0xb8] sm:$0xff]  ;;  %v748_v24 = vld [vmem:[%s1011_s4 + $0xc0] sm:$0xff]  ;;  %v753_v25 = vld [vmem:[%s1011_s4 + $0xc8] sm:$0xff] }
   0xa   :  { %v758_v26 = vld [vmem:[%s1011_s4 + $0xd0] sm:$0xff]  ;;  %v763_v27 = vld [vmem:[%s1011_s4 + $0xd8] sm:$0xff]  ;;  %v768_v28 = vld [vmem:[%s1011_s4 + $0xe0] sm:$0xff] }
   0xb   :  { %v773_v29 = vld [vmem:[%s1011_s4 + $0xe8] sm:$0xff]  ;;  %v778_v30 = vld [vmem:[%s1011_s4 + $0xf0] sm:$0xff]  ;;  %v783_v31 = vld [vmem:[%s1011_s4 + $0xf8] sm:$0xff] }
   0xc   :  { %v788_v32 = vld [vmem:[%s1011_s4 + $0x100] sm:$0xff]  ;;  %v793_v33 = vld [vmem:[%s1011_s4 + $0x108] sm:$0xff]  ;;  %v798_v34 = vld [vmem:[%s1011_s4 + $0x110] sm:$0xff] }
   0xd   :  { %v803_v35 = vld [vmem:[%s1011_s4 + $0x118] sm:$0xff]  ;;  %v808_v36 = vld [vmem:[%s1011_s4 + $0x120] sm:$0xff]  ;;  %v813_v37 = vld [vmem:[%s1011_s4 + $0x128] sm:$0xff] }
   0xe   :  { %v818_v38 = vld [vmem:[%s1011_s4 + $0x130] sm:$0xff]  ;;  %v823_v39 = vld [vmem:[%s1011_s4 + $0x138] sm:$0xff]  ;;  %v828_v40 = vld [vmem:[%s1011_s4 + $0x140] sm:$0xff] }
   0xf   :  { %v833_v41 = vld [vmem:[%s1011_s4 + $0x148] sm:$0xff]  ;;  %v838_v42 = vld [vmem:[%s1011_s4 + $0x150] sm:$0xff]  ;;  %v843_v43 = vld [vmem:[%s1011_s4 + $0x158] sm:$0xff] }
  0x10   :  { %v848_v44 = vld [vmem:[%s1011_s4 + $0x160] sm:$0xff]  ;;  %v853_v45 = vld [vmem:[%s1011_s4 + $0x168] sm:$0xff]  ;;  %v858_v46 = vld [vmem:[%s1011_s4 + $0x170] sm:$0xff] }
  0x11   :  { %v863_v47 = vld [vmem:[%s1011_s4 + $0x178] sm:$0xff] }
  0x12 LB: > { %v592_v49 = vmov 0.0   ;;  %s932_s4 = sshll.u32 %s590_s14, 3  ;;  %v1015_v1 = vld [vmem:[#allocation3_spill] sm:$0xff]  ;;  %v1016_v0 = vld [vmem:[#allocation2_spill] sm:$0xff]  ;;  %vm593_vm0 = vmmov 0   ;;  %v594_v51 = vmov 0   ;;  %s590_s14 = sphi %s867_s14, %s75_s14   ;;  %v586_v48 = vphi %v865_v48, %v330_v48  }
  0x13   : > { %441 = vmatprep.subr.mxu0 %v592_v49  ;;  %476 = vmatprep.subr.mxu1 %v592_v49  ;;  %s78_s17 = scalar_lea.vmem %s1010_s3, %s932_s4  ;;  %s299_s20 = scalar_lea.vmem %s1008_s1, %s932_s4 }
  0x14   : > { %442 = vmatpush3.msra.mxu0 %v703_v15  ;;  %477 = vmatpush3.msra.mxu1 %v783_v31  ;;  %v79_v50 = vld [vmem:[%s78_s17] sm:$0xff]  ;;  %s290_s23 = scalar_lea.vmem %s1007_s0, %s932_s4  ;;  %s308_s26 = scalar_lea.vmem %s1009_s2, %s932_s4 }
  0x15   : > { %443 = vmatprep.subr.mxu0 %v592_v49  ;;  %478 = vmatprep.subr.mxu1 %v592_v49  ;;  %v323_v52 = vsub.f32 1.0, %v79_v50  ;;  %v300_v53 = vld [vmem:[%s299_s20] sm:$0xff]  ;;  %s331_s29 = scalar_lea.vmem %s1012_s5, %s932_s4  ;;  %s75_s14 = sadd.s32 1, %s590_s14  }
  0x16   : > { %444 = vmatpush3.msra.mxu0 %v698_v14  ;;  %479 = vmatpush3.msra.mxu1 %v778_v30  ;;  %v291_v60 = vld [vmem:[%s290_s23] sm:$0xff]  ;;  %p72_p0 = scmp.ge.s32.totalorder %s75_s14, 16  }
  0x17   : > { %445 = vmatprep.subr.mxu0 %v592_v49  ;;  %480 = vmatprep.subr.mxu1 %v592_v49 }
  0x18   : > { %446 = vmatpush3.msra.mxu0 %v693_v13  ;;  %481 = vmatpush3.msra.mxu1 %v773_v29 }
  0x19   : > { %447 = vmatprep.subr.mxu0 %v592_v49  ;;  %482 = vmatprep.subr.mxu1 %v592_v49 }
  0x1a   : > { %448 = vmatpush3.msra.mxu0 %v688_v12  ;;  %483 = vmatpush3.msra.mxu1 %v768_v28 }
  0x1b   : > { %449 = vmatprep.subr.mxu0 %v592_v49  ;;  %484 = vmatprep.subr.mxu1 %v592_v49 }
  0x1c   : > { %450 = vmatpush3.msra.mxu0 %v683_v11  ;;  %485 = vmatpush3.msra.mxu1 %v763_v27 }
  0x1d   : > { %451 = vmatprep.subr.mxu0 %v592_v49  ;;  %486 = vmatprep.subr.mxu1 %v592_v49 }
  0x1e   : > { %452 = vmatpush3.msra.mxu0 %v678_v10  ;;  %487 = vmatpush3.msra.mxu1 %v758_v26 }
  0x1f   : > { %453 = vmatprep.subr.mxu0 %v592_v49  ;;  %488 = vmatprep.subr.mxu1 %v592_v49 }
  0x20   : > { %454 = vmatpush3.msra.mxu0 %v673_v9  ;;  %489 = vmatpush3.msra.mxu1 %v753_v25 }
  0x21   : > { %455 = vmatprep.subr.mxu0 %v592_v49  ;;  %490 = vmatprep.subr.mxu1 %v592_v49 }
  0x22   : > { %456 = vmatpush3.msra.mxu0 %v668_v8  ;;  %491 = vmatpush3.msra.mxu1 %v748_v24 }
  0x23   : > { %457 = vmatprep.subr.mxu0 %v592_v49  ;;  %492 = vmatprep.subr.mxu1 %v592_v49 }
  0x24   : > { %458 = vmatpush3.msra.mxu0 %v663_v7  ;;  %493 = vmatpush3.msra.mxu1 %v743_v23 }
  0x25   : > { %459 = vmatprep.subr.mxu0 %v592_v49  ;;  %494 = vmatprep.subr.mxu1 %v592_v49 }
  0x26   : > { %460 = vmatpush3.msra.mxu0 %v658_v6  ;;  %495 = vmatpush3.msra.mxu1 %v738_v22 }
  0x27   : > { %461 = vmatprep.subr.mxu0 %v592_v49  ;;  %496 = vmatprep.subr.mxu1 %v592_v49 }
  0x28   : > { %462 = vmatpush3.msra.mxu0 %v653_v5  ;;  %497 = vmatpush3.msra.mxu1 %v733_v21 }
  0x29   : > { %463 = vmatprep.subr.mxu0 %v592_v49  ;;  %498 = vmatprep.subr.mxu1 %v592_v49 }
  0x2a   : > { %464 = vmatpush3.msra.mxu0 %v648_v4  ;;  %499 = vmatpush3.msra.mxu1 %v728_v20 }
  0x2b   : > { %465 = vmatprep.subr.mxu0 %v592_v49  ;;  %500 = vmatprep.subr.mxu1 %v592_v49 }
  0x2c   : > { %466 = vmatpush3.msra.mxu0 %v643_v3  ;;  %501 = vmatpush3.msra.mxu1 %v723_v19 }
  0x2d   : > { %467 = vmatprep.subr.mxu0 %v592_v49  ;;  %502 = vmatprep.subr.mxu1 %v592_v49 }
  0x2e   : > { %468 = vmatpush3.msra.mxu0 %v638_v2  ;;  %503 = vmatpush3.msra.mxu1 %v718_v18 }
  0x2f   : > { %469 = vmatprep.subr.mxu0 %v592_v49  ;;  %504 = vmatprep.subr.mxu1 %v592_v49 }
  0x30   : > { %470 = vmatpush3.msra.mxu0 %v1015_v1  ;;  %505 = vmatpush3.msra.mxu1 %v713_v17 }
  0x31   : > { %471 = vmatprep.subr.mxu0 %v592_v49  ;;  %506 = vmatprep.subr.mxu1 %v592_v49 }
  0x32   : > { %472 = vmatpush3.msra.mxu0 %v1016_v0  ;;  %507 = vmatpush3.msra.mxu1 %v708_v16 }
  0x33   : > { %508 = vmatprep.mubr.msk.f32.mxu1 %vm593_vm0, %v592_v49  ;;  %473 = vmatprep.mubr.msk.f32.mxu0 %vm593_vm0, %v592_v49 }
  0x34   : > { %509 = vmatmul.mubr.f32.vlgmr.msra.gmra.mxu1 %v586_v48  ;;  %511 = vmatprep.subr.mxu0 %v592_v49 }
  0x35   : > { %474 = vmatmul.mubr.f32.vlgmr.msra.gmra.mxu0 %v586_v48  ;;  %565 = vset.pattern.permute.xlu0 %v594_v51 }
  0x36   : > { %512 = vmatpush3.msra.mxu0 %v863_v47  ;;  %543 = vmatprep.mubr.msk.f32.mxu0 %vm593_vm0, %v592_v49 }
  0x37   : > { %513 = vmatprep.subr.mxu0 %v592_v49  ;;  %319 = vperm.xlu0 %565, %v79_v50  }
  0x38   : > { %514 = vmatpush3.msra.mxu0 %v858_v46 }
  0x39   : > { %515 = vmatprep.subr.mxu0 %v592_v49 }
  0x3a   : > { %516 = vmatpush3.msra.mxu0 %v853_v45 }
  0x3b   : > { %517 = vmatprep.subr.mxu0 %v592_v49  ;;  %326 = vperm.xlu0 %565, %v323_v52  }
  0x3c   : > { %518 = vmatpush3.msra.mxu0 %v848_v44 }
  0x3d   : > { %519 = vmatprep.subr.mxu0 %v592_v49 }
  0x3e   : > { %520 = vmatpush3.msra.mxu0 %v843_v43 }
  0x3f   : > { %521 = vmatprep.subr.mxu0 %v592_v49 }
  0x40   : > { %522 = vmatpush3.msra.mxu0 %v838_v42 }
  0x41   : > { %523 = vmatprep.subr.mxu0 %v592_v49 }
  0x42   : > { %524 = vmatpush3.msra.mxu0 %v833_v41 }
  0x43   : > { %525 = vmatprep.subr.mxu0 %v592_v49 }
  0x44   : > { %526 = vmatpush3.msra.mxu0 %v828_v40 }
  0x45   : > { %527 = vmatprep.subr.mxu0 %v592_v49 }
  0x46   : > { %528 = vmatpush3.msra.mxu0 %v823_v39 }
  0x47   : > { %529 = vmatprep.subr.mxu0 %v592_v49 }
  0x48   : > { %530 = vmatpush3.msra.mxu0 %v818_v38 }
  0x49   : > { %531 = vmatprep.subr.mxu0 %v592_v49 }
  0x4a   : > { %532 = vmatpush3.msra.mxu0 %v813_v37 }
  0x4b   : > { %533 = vmatprep.subr.mxu0 %v592_v49 }
  0x4c   : > { %534 = vmatpush3.msra.mxu0 %v808_v36 }
  0x4d   : > { %535 = vmatprep.subr.mxu0 %v592_v49 }
  0x4e   : > { %536 = vmatpush3.msra.mxu0 %v803_v35 }
  0x4f   : > { %537 = vmatprep.subr.mxu0 %v592_v49 }
  0x50   : > { %538 = vmatpush3.msra.mxu0 %v798_v34 }
  0x51   : > { %539 = vmatprep.subr.mxu0 %v592_v49 }
  0x52   : > { %540 = vmatpush3.msra.mxu0 %v793_v33 }
  0x53   : > { %541 = vmatprep.subr.mxu0 %v592_v49 }
  0x54   : > { %542 = vmatpush3.msra.mxu0 %v788_v32 }
  0x55   : > { %544 = vmatmul.mubr.f32.vlgmr.msra.gmra.mxu0 %v586_v48 }
  0xf4   : > { %v216_v54 = vpop.f32.mrf.mxu1 }
  0xf5   : > { %v301_v55 = vadd.f32 %v300_v53, %v216_v54  ;;  %v146_v56 = vpop.f32.mrf.mxu0  ;;  %v309_v54 = vld [vmem:[%s308_s26] sm:$0xff] }
  0xf6   : > { %v510_v57 = vpop.f32.mrf.mxu1  ;;  %v292_v61 = vadd.f32 %v291_v60, %v146_v56 }
  0xf7   : > { %v389_v58 = vmul.f32 -1.442695, %v301_v55  ;;  %v475_v59 = vpop.f32.mrf.mxu0 }
  0xf8   : > { %v388_v62 = vmul.f32 -1.442695, %v292_v61  ;;  %v320_v59 = vpop.permute.xlu0 %319 }
  0xf9   : > { %566 = vpow2.f32 %v389_v58 }
  0xfa   : > { %568 = vpow2.f32 %v388_v62 }
 0x106   : > { %v567_v63 = vpop.eup %566 }
 0x107   : > { %v305_v49 = vadd.f32 1.0, %v567_v63  ;;  %v569_v50 = vpop.eup %568 }
 0x108   : > { %v296_v51 = vadd.f32 1.0, %v569_v50 }
 0x109   : > { %570 = vrcp.f32 %v305_v49  ;;  %v327_v49 = vpop.permute.xlu0 %326 }
 0x10a   : > { %572 = vrcp.f32 %v296_v51  ;;  %v329_v1 = vmul.f32 %v586_v48, %v327_v49 }
 0x115   : > { %v286_v52 = vpop.f32.mrf.mxu0 }
 0x116   : > { %v571_v53 = vpop.eup %570 }
 0x117   : > { %v310_v55 = vmul.f32 %v571_v53, %v286_v52  ;;  %v545_v57 = vpop.f32.mrf.mxu0  ;;  %v573_v56 = vpop.eup %572 }
 0x118   : > { %v313_v60 = vsub.f32 1.0, %v573_v56  ;;  %v315_v63 = vmul.f32 %v586_v48, %v573_v56 }
 0x119   : > { %v311_v58 = vadd.f32 %v310_v55, %v309_v54 }
 0x11b   : > { %574 = vtanh.f32 %v311_v58 }
 0x128   : > { %v575_v61 = vpop.eup %574 }
 0x129   : > { %v314_v62 = vmul.f32 %v575_v61, %v313_v60 }
 0x12b   : > { %v316_v50 = vadd.f32 %v315_v63, %v314_v62 }
 0x12d   : > { %v322_v0 = vmul.f32 %v320_v59, %v316_v50  ;;  %74 = sbr.rel (!%p72_p0) target bundleno = 18 (0x12), region = 54 }
 0x12f   : > { %v330_v48 = vadd.f32 %v329_v1, %v322_v0  }
 0x131   : > { %332 = vst [vmem:[%s331_s29] sm:$0xff] %v330_v48 }

// kernel: scr_forward.5
= control target key start
LH: loop header
LB: loop body
LE: loop exit
PB: predicated region body
PF: predicated region fallthrough
CT: control target
= control target key end

     0   :  { %v1134_v1 = vmov 0.0   ;;  %vm1135_vm0 = vmmov 0   ;;  %s1446_s1 = inlined_call_operand.vmem [shape: bf16[384,128], index: 1, kind: input, shape index: {}]   ;;  %s1447_s0 = inlined_call_operand.vmem [shape: bf16[16,384], index: 0, kind: input, shape index: {}]   ;;  %s1448_s3 = inlined_call_operand.vmem [shape: bf16[128,128], index: 3, kind: input, shape index: {}]   ;;  %s1449_s5 = inlined_call_operand.vmem [shape: bf16[3,128,128], index: 5, kind: input, shape index: {}]   ;;  %s1450_s2 = inlined_call_operand.vmem [shape: f32[1,128], index: 2, kind: input, shape index: {}]   ;;  %s1451_s4 = inlined_call_operand.vmem [shape: f32[1,128], index: 4, kind: input, shape index: {}]   ;;  %s1452_s6 = inlined_call_operand.vmem [shape: f32[3,1,128], index: 6, kind: input, shape index: {}]   ;;  %s1453_s7 = inlined_call_operand.vmem [shape: f32[16,128], index: 7, kind: output, shape index: {0}]   ;;  %s1454_s8 = inlined_call_operand.vmem [shape: f32[16,128], index: 8, kind: output, shape index: {1}]   ;;  %s1455_s9 = inlined_call_operand.vmem [shape: f32[16,128], index: 9, kind: output, shape index: {2}]  }
   0x1   :  { %v1074_v0 = vld [vmem:[%s1446_s1 + $0x78] sm:$0xff]   ;;  %972 = vmatprep.subr.bf16.mxu1 %v1134_v1  ;;  %988 = vmatprep.mubr.msk.bf16.mxu1 %vm1135_vm0, %v1134_v1  ;;  %v1077_v4 = vld [vmem:[%s1446_s1 + $0x70] sm:$0xff]   ;;  %v1080_v7 = vld [vmem:[%s1446_s1 + $0x68] sm:$0xff]  }
   0x2   :  { %v1075_v2 = vld [vmem:[%s1446_s1 + $0x38] sm:$0xff]   ;;  %905 = vmatprep.subr.bf16.mxu0 %v1074_v0  ;;  %v1078_v5 = vld [vmem:[%s1446_s1 + $0x30] sm:$0xff]   ;;  %v1081_v8 = vld [vmem:[%s1446_s1 + $0x28] sm:$0xff]  }
   0x3   :  { %v1076_v3 = vld [vmem:[%s1446_s1 + $0xb8] sm:$0xff]   ;;  %906 = vmatpush3.bf16.msra.mxu0 %v1075_v2  ;;  %v1079_v6 = vld [vmem:[%s1446_s1 + $0xb0] sm:$0xff]   ;;  %v1082_v9 = vld [vmem:[%s1446_s1 + $0xa8] sm:$0xff]  }
   0x4   :  { %973 = vmatpush3.bf16.msra.mxu1 %v1076_v3  ;;  %907 = vmatprep.subr.bf16.mxu0 %v1077_v4  ;;  %v1083_v10 = vld [vmem:[%s1446_s1 + $0x60] sm:$0xff]   ;;  %v1086_v13 = vld [vmem:[%s1446_s1 + $0x58] sm:$0xff]   ;;  %v1089_v16 = vld [vmem:[%s1446_s1 + $0x50] sm:$0xff]  }
   0x5   :  { %974 = vmatprep.subr.bf16.mxu1 %v1134_v1  ;;  %v1084_v11 = vld [vmem:[%s1446_s1 + $0x20] sm:$0xff]   ;;  %v1087_v14 = vld [vmem:[%s1446_s1 + $0x18] sm:$0xff]   ;;  %v1090_v17 = vld [vmem:[%s1446_s1 + $0x10] sm:$0xff]  }
   0x6   :  { %v1085_v12 = vld [vmem:[%s1446_s1 + $0xa0] sm:$0xff]   ;;  %v1088_v15 = vld [vmem:[%s1446_s1 + $0x98] sm:$0xff]   ;;  %v1091_v18 = vld [vmem:[%s1446_s1 + $0x90] sm:$0xff]  }
   0x7   :  { %908 = vmatpush3.bf16.msra.mxu0 %v1078_v5  ;;  %v1092_v19 = vld [vmem:[%s1446_s1 + $0x48] sm:$0xff]   ;;  %v1095_v22 = vld [vmem:[%s1446_s1 + $0x40] sm:$0xff]   ;;  %v1102_v28 = vld [vmem:[%s1448_s3 + $0x38] sm:$0xff]  }
   0x8   :  { %975 = vmatpush3.bf16.msra.mxu1 %v1079_v6  ;;  %909 = vmatprep.subr.bf16.mxu0 %v1080_v7  ;;  %v1093_v20 = vld [vmem:[%s1446_s1 + $0x8] sm:$0xff]   ;;  %v1100_v23 = vld [vmem:[%s1447_s0 + $0x4] ss:$12 sps:$4 sm:$0xff]   ;;  %v1106_v32 = vld [vmem:[%s1448_s3 + $0x18] sm:$0xff]  }
   0x9   :  { %976 = vmatprep.subr.bf16.mxu1 %v1134_v1  ;;  %v1094_v21 = vld [vmem:[%s1446_s1 + $0x88] sm:$0xff]   ;;  %v1096_v24 = vld [vmem:[%s1446_s1] sm:$0xff]   ;;  %281 = vmatprep.mubr.bf16.mxu0 %v1100_v23  ;;  %v1103_v29 = vld [vmem:[%s1448_s3 + $0x30] sm:$0xff]  }
   0xa   :  { %v1097_v25 = vld [vmem:[%s1446_s1 + $0x80] sm:$0xff]   ;;  %v1101_v27 = vld [vmem:[%s1447_s0 + $0x8] ss:$12 sps:$4 sm:$0xff]   ;;  %v1110_v36 = vld [vmem:[%s1449_s5 + $0x38] sm:$0xff]  }
   0xb   :  { %910 = vmatpush3.bf16.msra.mxu0 %v1081_v8  ;;  %v1098_v26 = vld [vmem:[%s1447_s0] ss:$12 sps:$4 sm:$0xff]   ;;  %v1107_v33 = vld [vmem:[%s1448_s3 + $0x10] sm:$0xff]   ;;  %v1118_v40 = vld [vmem:[%s1449_s5 + $0x18] sm:$0xff]  }
   0xc   :  { %977 = vmatpush3.bf16.msra.mxu1 %v1082_v9  ;;  %911 = vmatprep.subr.bf16.mxu0 %v1083_v10  ;;  %v1104_v30 = vld [vmem:[%s1448_s3 + $0x28] sm:$0xff]   ;;  %v1105_v31 = vld [vmem:[%s1448_s3 + $0x20] sm:$0xff]   ;;  %v1112_v37 = vld [vmem:[%s1449_s5 + $0x30] sm:$0xff]  }
   0xd   :  { %978 = vmatprep.subr.bf16.mxu1 %v1134_v1  ;;  %v1108_v34 = vld [vmem:[%s1448_s3 + $0x8] sm:$0xff]   ;;  %v1109_v35 = vld [vmem:[%s1448_s3] sm:$0xff]   ;;  %v1120_v41 = vld [vmem:[%s1449_s5 + $0x10] sm:$0xff]  }
   0xe   :  { %v1114_v38 = vld [vmem:[%s1449_s5 + $0x28] sm:$0xff]   ;;  %v1116_v39 = vld [vmem:[%s1449_s5 + $0x20] sm:$0xff]   ;;  %v1111_v59 = vld [vmem:[%s1449_s5 + $0x78] sm:$0xff]  }
   0xf   :  { %912 = vmatpush3.bf16.msra.mxu0 %v1084_v11  ;;  %v807_v44 = vld [vmem:[%s1450_s2] ss:$0 sm:$0xff]  ;;  %v1113_v61 = vld [vmem:[%s1449_s5 + $0x70] sm:$0xff]   ;;  %v1115_v62 = vld [vmem:[%s1449_s5 + $0x68] sm:$0xff]  }
  0x10   :  { %979 = vmatpush3.bf16.msra.mxu1 %v1085_v12  ;;  %913 = vmatprep.subr.bf16.mxu0 %v1086_v13  ;;  %v1117_v63 = vld [vmem:[%s1449_s5 + $0x60] sm:$0xff]   ;;  %v1119_v0 = vld [vmem:[%s1449_s5 + $0x58] sm:$0xff]   ;;  %v1121_v2 = vld [vmem:[%s1449_s5 + $0x50] sm:$0xff]  }
  0x11   :  { %980 = vmatprep.subr.bf16.mxu1 %v1134_v1  ;;  %v1122_v3 = vld [vmem:[%s1449_s5 + $0x8] sm:$0xff]   ;;  %v1124_v5 = vld [vmem:[%s1449_s5] sm:$0xff]  }
  0x12   :  { %v1123_v4 = vld [vmem:[%s1449_s5 + $0x48] sm:$0xff]   ;;  %v1125_v6 = vld [vmem:[%s1449_s5 + $0x40] sm:$0xff]  }
  0x13   :  { %914 = vmatpush3.bf16.msra.mxu0 %v1087_v14  ;;  %v835_v7 = vld [vmem:[%s1451_s4] ss:$0 sm:$0xff]  ;;  %v1132_v23 = vld [vmem:[%s1449_s5 + $0x88] sm:$0xff]  }
  0x14   :  { %981 = vmatpush3.bf16.msra.mxu1 %v1088_v15  ;;  %915 = vmatprep.subr.bf16.mxu0 %v1089_v16  ;;  %v1126_v16 = vld [vmem:[%s1449_s5 + $0xb8] sm:$0xff]  }
  0x15   :  { %982 = vmatprep.subr.bf16.mxu1 %v1134_v1 }
  0x17   :  { %916 = vmatpush3.bf16.msra.mxu0 %v1090_v17 }
  0x18   :  { %983 = vmatpush3.bf16.msra.mxu1 %v1091_v18  ;;  %917 = vmatprep.subr.bf16.mxu0 %v1092_v19  ;;  %v1127_v18 = vld [vmem:[%s1449_s5 + $0xb0] sm:$0xff]   ;;  %v1128_v19 = vld [vmem:[%s1449_s5 + $0xa8] sm:$0xff]  }
  0x19   :  { %984 = vmatprep.subr.bf16.mxu1 %v1134_v1 }
  0x1b   :  { %918 = vmatpush3.bf16.msra.mxu0 %v1093_v20  ;;  %v1129_v20 = vld [vmem:[%s1449_s5 + $0xa0] sm:$0xff]  }
  0x1c   :  { %985 = vmatpush3.bf16.msra.mxu1 %v1094_v21  ;;  %919 = vmatprep.subr.bf16.mxu0 %v1095_v22  ;;  %v1130_v21 = vld [vmem:[%s1449_s5 + $0x98] sm:$0xff]   ;;  %v1131_v22 = vld [vmem:[%s1449_s5 + $0x90] sm:$0xff]  }
  0x1d   :  { %986 = vmatprep.subr.bf16.mxu1 %v1134_v1 }
  0x1f   :  { %920 = vmatpush3.bf16.msra.mxu0 %v1096_v24  ;;  %v1133_v24 = vld [vmem:[%s1449_s5 + $0x80] sm:$0xff]  }
  0x20   :  { %987 = vmatpush3.bf16.msra.mxu1 %v1097_v25  ;;  %992 = vmatprep.subr.bf16.mxu0 %v1134_v1  ;;  %v844_v25 = vld [vmem:[%s1452_s6] ss:$0 sm:$0xff] }
  0x21   :  { %1012 = vmatprep.subr.bf16.mxu1 %v1134_v1 }
  0x22   :  { %282 = vmatmul.mubr.bf16.vlgmr.msra.gmra.mxu0 %v1098_v26  ;;  %v870_v26 = vld [vmem:[%s1452_s6 + $0x1] ss:$0 sm:$0xff] }
  0x23   :  { %989 = vmatmul.mubr.bf16.vlgmr.msra.gmra.mxu1 %v1101_v27  ;;  %993 = vmatpush3.bf16.msra.mxu0 %v1102_v28 }
  0x24   :  { %994 = vmatprep.subr.bf16.mxu0 %v1134_v1  ;;  %1008 = vmatprep.mubr.msk.bf16.mxu0 %vm1135_vm0, %v1134_v1 }
  0x25   :  { %1028 = vmatprep.mubr.msk.bf16.mxu1 %vm1135_vm0, %v1134_v1  ;;  %1013 = vmatpush3.bf16.msra.mxu1 %v1110_v36 }
  0x26   :  { %1014 = vmatprep.subr.bf16.mxu1 %v1134_v1 }
  0x27   :  { %995 = vmatpush3.bf16.msra.mxu0 %v1103_v29 }
  0x28   :  { %996 = vmatprep.subr.bf16.mxu0 %v1134_v1 }
  0x29   :  { %1015 = vmatpush3.bf16.msra.mxu1 %v1112_v37 }
  0x2a   :  { %1016 = vmatprep.subr.bf16.mxu1 %v1134_v1 }
  0x2b   :  { %997 = vmatpush3.bf16.msra.mxu0 %v1104_v30 }
  0x2c   :  { %998 = vmatprep.subr.bf16.mxu0 %v1134_v1 }
  0x2d   :  { %1017 = vmatpush3.bf16.msra.mxu1 %v1114_v38  ;;  %v896_v38 = vld [vmem:[%s1452_s6 + $0x2] ss:$0 sm:$0xff] }
  0x2e   :  { %1018 = vmatprep.subr.bf16.mxu1 %v1134_v1 }
  0x2f   :  { %999 = vmatpush3.bf16.msra.mxu0 %v1105_v31 }
  0x30   :  { %1000 = vmatprep.subr.bf16.mxu0 %v1134_v1 }
  0x31   :  { %1019 = vmatpush3.bf16.msra.mxu1 %v1116_v39 }
  0x32   :  { %1020 = vmatprep.subr.bf16.mxu1 %v1134_v1 }
  0x33   :  { %1001 = vmatpush3.bf16.msra.mxu0 %v1106_v32 }
  0x34   :  { %1002 = vmatprep.subr.bf16.mxu0 %v1134_v1 }
  0x35   :  { %1021 = vmatpush3.bf16.msra.mxu1 %v1118_v40 }
  0x36   :  { %1022 = vmatprep.subr.bf16.mxu1 %v1134_v1 }
  0x37   :  { %1003 = vmatpush3.bf16.msra.mxu0 %v1107_v33 }
  0x38   :  { %1004 = vmatprep.subr.bf16.mxu0 %v1134_v1 }
  0x39   :  { %1023 = vmatpush3.bf16.msra.mxu1 %v1120_v41 }
  0x3a   :  { %1024 = vmatprep.subr.bf16.mxu1 %v1134_v1 }
  0x3b   :  { %1005 = vmatpush3.bf16.msra.mxu0 %v1108_v34 }
  0x3c   :  { %1006 = vmatprep.subr.bf16.mxu0 %v1134_v1 }
  0x3d   :  { %1025 = vmatpush3.bf16.msra.mxu1 %v1122_v3 }
  0x3e   :  { %1026 = vmatprep.subr.bf16.mxu1 %v1134_v1 }
  0x3f   :  { %1007 = vmatpush3.bf16.msra.mxu0 %v1109_v35 }
  0x40   :  { %1032 = vmatprep.subr.bf16.mxu0 %v1134_v1 }
  0x41   :  { %1027 = vmatpush3.bf16.msra.mxu1 %v1124_v5 }
  0x42   :  { %1052 = vmatprep.subr.bf16.mxu1 %v1134_v1 }
  0xe2   :  { %v921_v42 = vpop.f32.mrf.mxu0 }
  0xe3   :  { %v324_v43 = vpop.f32.mrf.mxu1 }
  0xe4   :  { %v922_v45 = vpop.f32.mrf.mxu0 }
  0xe5   :  { %v923_v46 = vadd.f32 %v922_v45, %v921_v42  ;;  %v990_v47 = vpop.f32.mrf.mxu1 }
  0xe6   :  { %v924_v48 = vpop.f32.mrf.mxu0 }
  0xe7   :  { %v284_v49 = vadd.f32 %v923_v46, %v807_v44  ;;  %v327_v50 = vpop.f32.mrf.mxu1 }
  0xe8   :  { %v925_v51 = vpop.f32.mrf.mxu0 }
  0xe9   :  { %v926_v52 = vadd.f32 %v925_v51, %v924_v48  ;;  %v991_v53 = vpop.f32.mrf.mxu1  ;;  %v325_v54 = vadd.f32 %v324_v43, %v284_v49 }
  0xeb   :  { %v287_v55 = vadd.f32 %v926_v52, %v807_v44  ;;  %v331_v57 = vmax.f32 %v325_v54, 0.0 }
  0xed   :  { %v328_v56 = vadd.f32 %v327_v50, %v287_v55 }
  0xef   :  { %v332_v58 = vmax.f32 %v328_v56, 0.0 }
  0xf1   :  { %v333_v60 = vpack.c.bf16 %v332_v58, %v331_v57 }
  0xf3   :  { %1009 = vmatmul.mubr.bf16.vlgmr.msra.gmra.mxu0 %v333_v60 }
  0xf4   :  { %1033 = vmatpush3.bf16.msra.mxu0 %v1111_v59  ;;  %1048 = vmatprep.mubr.msk.bf16.mxu0 %vm1135_vm0, %v1134_v1 }
  0xf5   :  { %1034 = vmatprep.subr.bf16.mxu0 %v1134_v1 }
  0xf8   :  { %1035 = vmatpush3.bf16.msra.mxu0 %v1113_v61 }
  0xf9   :  { %1036 = vmatprep.subr.bf16.mxu0 %v1134_v1 }
  0xfc   :  { %1037 = vmatpush3.bf16.msra.mxu0 %v1115_v62 }
  0xfd   :  { %1038 = vmatprep.subr.bf16.mxu0 %v1134_v1 }
 0x100   :  { %1039 = vmatpush3.bf16.msra.mxu0 %v1117_v63 }
 0x101   :  { %1040 = vmatprep.subr.bf16.mxu0 %v1134_v1 }
 0x104   :  { %1041 = vmatpush3.bf16.msra.mxu0 %v1119_v0 }
 0x105   :  { %1042 = vmatprep.subr.bf16.mxu0 %v1134_v1 }
 0x108   :  { %1043 = vmatpush3.bf16.msra.mxu0 %v1121_v2 }
 0x109   :  { %1044 = vmatprep.subr.bf16.mxu0 %v1134_v1 }
 0x10c   :  { %1045 = vmatpush3.bf16.msra.mxu0 %v1123_v4 }
 0x10d   :  { %1046 = vmatprep.subr.bf16.mxu0 %v1134_v1 }
 0x110   :  { %1047 = vmatpush3.bf16.msra.mxu0 %v1125_v6 }
 0x1b3   :  { %v439_v8 = vpop.f32.mrf.mxu0 }
 0x1b4   :  { %v440_v10 = vadd.f32 %v835_v7, %v439_v8 }
 0x1b5   :  { %v1010_v9 = vpop.f32.mrf.mxu0 }
 0x1b6   :  { %v446_v14 = vmax.f32 %v440_v10, 0.0 }
 0x1b7   :  { %v442_v11 = vpop.f32.mrf.mxu0 }
 0x1b8   :  { %v443_v12 = vadd.f32 %v835_v7, %v442_v11 }
 0x1b9   :  { %v1011_v13 = vpop.f32.mrf.mxu0 }
 0x1ba   :  { %v447_v15 = vmax.f32 %v443_v12, 0.0 }
 0x1bc   :  { %v448_v17 = vpack.c.bf16 %v447_v15, %v446_v14 }
 0x1be   :  { %1029 = vmatmul.mubr.bf16.vlgmr.msra.gmra.mxu1 %v448_v17  ;;  %1049 = vmatmul.mubr.bf16.vlgmr.msra.gmra.mxu0 %v448_v17 }
 0x1bf   :  { %1053 = vmatpush3.bf16.msra.mxu1 %v1126_v16  ;;  %1068 = vmatprep.mubr.msk.bf16.mxu1 %vm1135_vm0, %v1134_v1 }
 0x1c0   :  { %1054 = vmatprep.subr.bf16.mxu1 %v1134_v1 }
 0x1c3   :  { %1055 = vmatpush3.bf16.msra.mxu1 %v1127_v18 }
 0x1c4   :  { %1056 = vmatprep.subr.bf16.mxu1 %v1134_v1 }
 0x1c7   :  { %1057 = vmatpush3.bf16.msra.mxu1 %v1128_v19 }
 0x1c8   :  { %1058 = vmatprep.subr.bf16.mxu1 %v1134_v1 }
 0x1cb   :  { %1059 = vmatpush3.bf16.msra.mxu1 %v1129_v20 }
 0x1cc   :  { %1060 = vmatprep.subr.bf16.mxu1 %v1134_v1 }
 0x1cf   :  { %1061 = vmatpush3.bf16.msra.mxu1 %v1130_v21 }
 0x1d0   :  { %1062 = vmatprep.subr.bf16.mxu1 %v1134_v1 }
 0x1d3   :  { %1063 = vmatpush3.bf16.msra.mxu1 %v1131_v22 }
 0x1d4   :  { %1064 = vmatprep.subr.bf16.mxu1 %v1134_v1 }
 0x1d7   :  { %1065 = vmatpush3.bf16.msra.mxu1 %v1132_v23 }
 0x1d8   :  { %1066 = vmatprep.subr.bf16.mxu1 %v1134_v1 }
 0x1db   :  { %1067 = vmatpush3.bf16.msra.mxu1 %v1133_v24 }
 0x1de   :  { %1069 = vmatmul.mubr.bf16.vlgmr.msra.gmra.mxu1 %v448_v17 }
 0x27e   :  { %v554_v27 = vpop.f32.mrf.mxu1  ;;  %v670_v28 = vpop.f32.mrf.mxu0 }
 0x27f   :  { %v555_v29 = vadd.f32 %v844_v25, %v554_v27  ;;  %v671_v30 = vadd.f32 %v870_v26, %v670_v28 }
 0x280   :  { %v1030_v31 = vpop.f32.mrf.mxu1  ;;  %v1050_v32 = vpop.f32.mrf.mxu0 }
 0x281   :  { %561 = vst [vmem:[%s1453_s7] sm:$0xff] %v555_v29  ;;  %677 = vst [vmem:[%s1454_s8] sm:$0xff] %v671_v30 }
 0x282   :  { %v557_v1 = vpop.f32.mrf.mxu1  ;;  %v673_v33 = vpop.f32.mrf.mxu0 }
 0x283   :  { %v558_v34 = vadd.f32 %v844_v25, %v557_v1  ;;  %v674_v35 = vadd.f32 %v870_v26, %v673_v33 }
 0x284   :  { %v1031_v36 = vpop.f32.mrf.mxu1  ;;  %v1051_v37 = vpop.f32.mrf.mxu0 }
 0x285   :  { %562 = vst [vmem:[%s1453_s7 + $0x8] sm:$0xff] %v558_v34  ;;  %678 = vst [vmem:[%s1454_s8 + $0x8] sm:$0xff] %v674_v35 }
 0x29e   :  { %v786_v39 = vpop.f32.mrf.mxu1 }
 0x29f   :  { %v787_v40 = vadd.f32 %v896_v38, %v786_v39 }
 0x2a0   :  { %v1070_v41 = vpop.f32.mrf.mxu1 }
 0x2a1   :  { %793 = vst [vmem:[%s1455_s9] sm:$0xff] %v787_v40 }
 0x2a2   :  { %v789_v42 = vpop.f32.mrf.mxu1 }
 0x2a3   :  { %v790_v43 = vadd.f32 %v896_v38, %v789_v42 }
 0x2a4   :  { %v1071_v44 = vpop.f32.mrf.mxu1 }
 0x2a5   :  { %794 = vst [vmem:[%s1455_s9 + $0x8] sm:$0xff] %v790_v43 }

// kernel: scr_forward.7
= control target key start
LH: loop header
LB: loop body
LE: loop exit
PB: predicated region body
PF: predicated region fallthrough
CT: control target
= control target key end

     0   :  { %s1041_s24 = smov 0   ;;  %s1043_s25 = smov 0   ;;  %s1132_s0 = inlined_call_operand.vmem [shape: f32[16,1024], index: 0, kind: input, shape index: {}, may-alias: {0,1}]   ;;  %s1133_s1 = inlined_call_operand.vmem [shape: f32[16,1024], index: 1, kind: input, shape index: {}, may-alias: {0,1}]   ;;  %s1134_s2 = inlined_call_operand.vmem [shape: f32[2,1,16], index: 2, kind: input, shape index: {}]   ;;  %s1135_s3 = inlined_call_operand.vmem [shape: f32[2,1,8], index: 3, kind: input, shape index: {}]   ;;  %s1136_s4 = inlined_call_operand.vmem [shape: s32[2,4,1], index: 4, kind: input, shape index: {}]   ;;  %s1137_s5 = inlined_call_operand.vmem [shape: s32[2,4,1], index: 5, kind: input, shape index: {}]   ;;  %s1138_s6 = inlined_call_operand.vmem [shape: f32[2,4,1], index: 6, kind: input, shape index: {}]   ;;  %s1139_s7 = inlined_call_operand.vmem [shape: f32[2,4,1], index: 7, kind: output, shape index: {}]  }
   0x1   :  { %s1045_s26 = smov 0  }
   0x2 LB: > { %s1054_s27 = sadd.s32 4294967295, %s996_s26   ;;  %s1056_s28 = sadd.s32 1, %s996_s26   ;;  %s996_s26 = sphi %s1045_s26, %s1142_s26   ;;  %s992_s25 = sphi %s1043_s25, %s1141_s25   ;;  %s988_s24 = sphi %s1041_s24, %s1140_s24  }
   0x3   : > { %s21_s29 = ssub.s32 %s996_s26, %s1056_s28  ;;  %s24_s30 = sadd.s32 1, %s992_s25 }
   0x4   : > { %p22_p0 = scmp.eq.s32.totalorder %s21_s29, 0  ;;  %p31_p1 = scmp.ne.s32.totalorder %s992_s25, %s988_s24 }
   0x5   : > { %p32_p2 = scmp.eq.s32.totalorder %s996_s26, 0  ;;  %p887_p4 = scmp.ge.s32.totalorder %s996_s26, 2 }
   0x6   : > { %s1063_s8 = scalar_select %p22_p0, %s992_s25, %s24_s30  }
   0x7   : > { %p33_p3 = por %p32_p2, %p31_p1  ;;  %241 = sbr.rel (%p887_p4) target bundleno = 18 (0x12), region = 16 }
   0xc   : > { %244 = sbr.rel (!%p33_p3) target bundleno = 18 (0x12), region = 20  ;;  %s246_s9 = sand.u32 (%p33_p3), 1, %s992_s25  }
   0xd   : > { %s889_s10 = sshll.u32 (%p33_p3), %s996_s26, 3  ;;  %s888_s11 = sshll.u32 (%p33_p3), %s246_s9, 4 }
   0xe   : > { %s250_s14 = scalar_lea.vmem (%p33_p3), %s1132_s0, %s889_s10  ;;  %s248_s15 = scalar_lea.vmem (%p33_p3), [#allocation2], %s888_s11 }
   0xf   : > { %v281_v0 = vld [vmem:[%s250_s14] sm:$0xff] (%p33_p3) }
  0x10   : > { %v283_v1 = vld [vmem:[%s250_s14 + $0x40] sm:$0xff] (%p33_p3)  ;;  %282 = vst [vmem:[%s248_s15] sm:$0xff] (%p33_p3), %v281_v0 }
  0x11   : > { %284 = vst [vmem:[%s248_s15 + $0x8] sm:$0xff] %v283_v1 }
  0x12 PF: > { %p890_p5 = scmp.ge.s32.totalorder %s996_s26, 1  ;;  %p331_p6 = scmp.lt.s32.totalorder %s996_s26, 3 }
  0x14   : > { %p332_p7 = pnand %p890_p5, %p331_p6 }
  0x15   : > { %s391_s16 = sadd.s32 (!%p332_p7), 2, %s1054_s27  ;;  %p397_p8 = scmp.lt.s32.totalorder (!%p332_p7), %s1054_s27, 1 }
  0x16   : > { %335 = sbr.rel (%p332_p7) target bundleno = 1178 (0x49a), region = 82  ;;  %p392_p9 = scmp.lt.s32.totalorder (!%p332_p7), %s391_s16, 7 }
  0x17   : > { %s338_s26 = sand.u32 (!%p332_p7), 1, %s988_s24  }
  0x18   : > { %s891_s29 = sshll.u32 (!%p332_p7), %s338_s26, 4 }
  0x19   : > { %s340_s30 = scalar_lea.vmem (!%p332_p7), [#allocation2], %s891_s29 }
  0x1b   : > { %v998_v2 = vmov 0.0   ;;  %vm999_vm0 = vmmov 0   ;;  %s1144_s27 = smov (!%p397_p8, %s1054_s27), 1  ;;  %s1146_s16 = smov (!%p392_p9, %s391_s16), 7  ;;  %vm501_vm1 = vcmask 57344   ;;  %vm427_vm2 = vcmask 64512  }
  0x1c   : > { %910 = vmatprep.subr.mxu0 %v998_v2  ;;  %912 = vmatprep.mubr.msk.f32.mxu0 %vm999_vm0, %v998_v2  ;;  %s402_s19 = scalar_lea.vmem %s1135_s3, %s1144_s27  ;;  %s892_s20 = sshll.u32 %s1146_s16, 3  ;;  %v420_v6 = vld [vmem:[%s340_s30 + $0x8] sm:$0xff]  ;;  %v419_v7 = vld [vmem:[%s340_s30] sm:$0xff]  ;;  %vm580_vm4 = vcmask 122880   ;;  %v1000_v19 = vmov 0   ;;  %vm717_vm5 = vcmask 1040384   ;;  %v594_v32 = vlaneseq }
  0x1d   : > { %915 = vmatprep.subr.mxu1 %v998_v2  ;;  %919 = vmatprep.mubr.msk.f32.mxu1 %vm999_vm0, %v998_v2  ;;  %v423_v3 = vld [vmem:[%s402_s19] sm:$0x1]  ;;  %s395_s23 = scalar_lea.vmem %s1133_s1, %s892_s20  ;;  %s399_s10 = scalar_lea.vmem %s1134_s2, %s1144_s27  ;;  %vm621_vm9 = vcmask 130048   ;;  %vm700_vm10 = vcmask 1043456   ;;  %vm737_vm15 = vcmask 3072  }
  0x1e   : > { %v502_v4 = vsel %vm501_vm1, %v423_v3, 0.0  ;;  %v421_v5 = vld [vmem:[%s395_s23] sm:$0xff]  ;;  %916 = vmatpush3.xpose.msra.mxu1 %v420_v6  ;;  %956 = vset.pattern.permute.xlu1 %v1000_v19  ;;  %s1099_s11 = sshll.u32 %s1144_s27, 2  ;;  %v595_v33 = vand.u32 127, %v594_v32  ;;  %v609_v36 = vshrl.u32 %v594_v32, 7 }
  0x1f   : > { %503 = vadd.xlane.f32.xlu0 %v502_v4  ;;  %911 = vmatpush3.msra.mxu0 %v421_v5  ;;  %v422_v14 = vld [vmem:[%s399_s10] sm:$0x1]  ;;  %s410_s14 = scalar_lea.vmem %s1137_s5, %s1099_s11  ;;  %s406_s16 = scalar_lea.vmem %s1136_s4, %s1099_s11 }
  0x20   : > { %913 = vmatmul.mubr.msk.f32.vlgmr.msra.gmra.mxu0 %vm427_vm2, %v423_v3  ;;  %922 = vmatprep.subr.mxu0 %v998_v2  ;;  %vm578_vm3 = vcmp.gt.f32.partialorder %v422_v14, 0.0  ;;  %v425_v20 = vld [vmem:[%s410_s14] sm:$0xf]  ;;  %v610_v37 = vsub.s32 0, %v609_v36  ;;  %s414_s19 = scalar_lea.vmem %s1138_s6, %s1099_s11  ;;  %s418_s22 = scalar_lea.vmem %s1139_s7, %s1099_s11 }
  0x21   : > { %926 = vmatprep.mubr.msk.f32.mxu0 %vm999_vm0, %v998_v2  ;;  %923 = vmatpush3.msra.mxu0 %v420_v6  ;;  %v424_v27 = vld [vmem:[%s406_s16] sm:$0xf] }
  0x22   : > { %917 = vmatprep.subr.mxu1 %v998_v2  ;;  %924 = vmatprep.subr.mxu0 %v998_v2  ;;  %v611_v38 = vrot.slane %v422_v14, %v610_v37  ;;  %v426_v5 = vld [vmem:[%s414_s19] sm:$0xf] }
  0x23   : > { %918 = vmatpush3.xpose.msra.mxu1 %v419_v7  ;;  %925 = vmatpush3.msra.mxu0 %v419_v7 }
  0x24   : > { %957 = vset.pattern.permute.xlu0 %v1000_v19 }
  0xa8   : > { %v504_v8 = vpop.xlane.xlu0 %503 }
  0xa9   : > { %v505_v9 = vadd.f32 1e-06, %v504_v8 }
  0xab   : > { %958 = vrcp.f32 %v505_v9 }
  0xb8   : > { %v959_v10 = vpop.eup %958 }
  0xe0   : > { %v497_v11 = vpop.f32.mrf.mxu0 }
  0xe1   : > { %v507_v12 = vmul.f32 %v959_v10, %v497_v11 }
  0xe2   : > { %v914_v13 = vpop.f32.mrf.mxu0 }
  0xe3   : > { %920 = vmatmul.mubr.f32.vlgmr.msra.gmra.mxu1 %v507_v12  ;;  %v716_v28 = vmul.f32 %v507_v12, %v507_v12  ;;  %v698_v45 = vrot.slane %v507_v12, %v610_v37 }
  0xe5   : > { %v718_v29 = vsel %vm717_vm5, %v716_v28, 0.0 }
 0x1a3   : > { %v574_v15 = vpop.f32.mrf.mxu1 }
 0x1a4   : > { %v579_v16 = vsel %vm578_vm3, %v574_v15, -1e+30 }
 0x1a5   : > { %v921_v17 = vpop.f32.mrf.mxu1  ;;  %v581_v18 = vsel %vm580_vm4, %v579_v16, -inf }
 0x1a6   : > { %582 = vmax.xlane.f32.xlu0 %v581_v18 }
 0x1bc   : > { %601 = vperm.xlu0 %957, %v425_v20  }
 0x22f   : > { %v583_v21 = vpop.xlane.xlu0 %582 }
 0x230   : > { %v584_v22 = vsub.f32 %v579_v16, %v583_v21 }
 0x232   : > { %v585_v23 = vmul.f32 1.442695, %v584_v22 }
 0x234   : > { %960 = vpow2.f32 %v585_v23 }
 0x237   : > { %v602_v35 = vpop.permute.xlu0 %601 }
 0x238   : > { %vm603_vm7 = vcmp.le.s32.totalorder %v595_v33, %v602_v35 }
 0x241   : > { %v961_v24 = vpop.eup %960 }
 0x242   : > { %v587_v25 = vmul.f32 %v961_v24, %v422_v14 }
 0x244   : > { %v588_v26 = vsel %vm580_vm4, %v587_v25, 0.0 }
 0x245   : > { %589 = vadd.xlane.f32.xlu1 %v588_v26 }
 0x256   : > { %597 = vperm.xlu1 %956, %v424_v27  }
 0x27a   : > { %719 = vadd.xlane.f32.xlu1 %v718_v29 }
 0x2ce   : > { %v590_v30 = vpop.xlane.xlu1 %589 }
 0x2cf   : > { %v591_v31 = vadd.f32 1e-06, %v590_v30 }
 0x2d1   : > { %962 = vrcp.f32 %v591_v31 }
 0x2d2   : > { %v598_v34 = vpop.permute.xlu1 %597 }
 0x2d3   : > { %vm599_vm6 = vcmp.ge.s32.totalorder %v595_v33, %v598_v34 }
 0x2d4   : > { %vm604_vm8 = vmand %vm599_vm6, %vm603_vm7 }
 0x2d5   : > { %v898_v39 = vsel %vm604_vm8, 1.0, %v998_v2 }
 0x2d6   : > { %v613_v42 = vmul.f32 %v898_v39, %v611_v38 }
 0x2de   : > { %v963_v40 = vpop.eup %962 }
 0x2df   : > { %v593_v41 = vmul.f32 %v963_v40, %v587_v25 }
 0x2e1   : > { %v618_v43 = vrot.slane %v593_v41, %v610_v37 }
 0x2e3   : > { %v620_v44 = vmul.f32 %v618_v43, %v613_v42 }
 0x2e5   : > { %927 = vmatmul.mubr.msk.f32.vlgmr.msra.gmra.mxu0 %vm621_vm9, %v620_v44 }
 0x303   : > { %v720_v52 = vpop.xlane.xlu1 %719 }
 0x304   : > { %v721_v53 = vadd.f32 1e-06, %v720_v52 }
 0x306   : > { %964 = vrsqrt.f32 %v721_v53  ;;  %vm724_vm11 = vcmp.eq.f32.partialorder %v721_v53, inf  ;;  %v727_v59 = vand.u32 2147483648, %v721_v53  ;;  %vm726_vm12 = vcmp.eq.f32.partialorder %v721_v53, 0.0 }
 0x313   : > { %v965_v56 = vpop.eup %964 }
 0x314   : > { %v723_v57 = vmul.f32 %v965_v56, %v721_v53 }
 0x316   : > { %v725_v58 = vsel %vm724_vm11, %v721_v53, %v723_v57 }
 0x317   : > { %v728_v61 = vsel %vm726_vm12, %v727_v59, %v725_v58 }
 0x318   : > { %v732_v1 = vrot.slane %v728_v61, %v610_v37 }
 0x3a5   : > { %v691_v46 = vpop.f32.mrf.mxu0 }
 0x3a6   : > { %v699_v47 = vmul.f32 %v698_v45, %v691_v46  ;;  %v704_v48 = vmul.f32 %v691_v46, %v691_v46 }
 0x3a7   : > { %v928_v49 = vpop.f32.mrf.mxu0 }
 0x3a8   : > { %v705_v50 = vsel %vm700_vm10, %v704_v48, 0.0  ;;  %v701_v51 = vsel %vm700_vm10, %v699_v47, 0.0 }
 0x3a9   : > { %706 = vadd.xlane.f32.xlu0 %v705_v50  ;;  %702 = vadd.xlane.f32.xlu1 %v701_v51 }
 0x432   : > { %v707_v54 = vpop.xlane.xlu0 %706  ;;  %v703_v6 = vpop.xlane.xlu1 %702 }
 0x433   : > { %v708_v55 = vadd.f32 1e-06, %v707_v54 }
 0x435   : > { %966 = vrsqrt.f32 %v708_v55  ;;  %vm711_vm13 = vcmp.eq.f32.partialorder %v708_v55, inf  ;;  %v714_v63 = vand.u32 2147483648, %v708_v55  ;;  %vm713_vm14 = vcmp.eq.f32.partialorder %v708_v55, 0.0 }
 0x442   : > { %v967_v60 = vpop.eup %966 }
 0x443   : > { %v710_v62 = vmul.f32 %v967_v60, %v708_v55 }
 0x445   : > { %v712_v0 = vsel %vm711_vm13, %v708_v55, %v710_v62 }
 0x446   : > { %v715_v2 = vsel %vm713_vm14, %v714_v63, %v712_v0 }
 0x447   : > { %v733_v3 = vmul.f32 %v732_v1, %v715_v2 }
 0x449   : > { %968 = vrcp.f32 %v733_v3 }
 0x456   : > { %v969_v4 = vpop.eup %968 }
 0x457   : > { %v735_v7 = vmul.f32 %v969_v4, %v703_v6 }
 0x459   : > { %v736_v8 = vadd.f32 %v735_v7, %v426_v5 }
 0x45b   : > { %v738_v9 = vsel %vm737_vm15, %v736_v8, -inf }
 0x45c   : > { %v739_v10 = vrot.slane %v738_v9, 4 }
 0x45e   : > { %v740_v11 = vmax.f32 %v738_v9, %v739_v10 }
 0x460   : > { %v741_v12 = vrot.slane %v740_v11, 2 }
 0x462   : > { %v742_v13 = vmax.f32 %v740_v11, %v741_v12 }
 0x464   : > { %v743_v14 = vrot.slane %v742_v13, 1 }
 0x466   : > { %v744_v15 = vmax.f32 %v742_v13, %v743_v14 }
 0x468   : > { %v745_v16 = vsub.f32 %v736_v8, %v744_v15 }
 0x46a   : > { %v746_v17 = vmul.f32 1.442695, %v745_v16 }
 0x46c   : > { %970 = vpow2.f32 %v746_v17 }
 0x479   : > { %v971_v18 = vpop.eup %970 }
 0x47a   : > { %v748_v19 = vsel %vm737_vm15, %v971_v18, 0.0 }
 0x47b   : > { %v749_v20 = vrot.slane %v748_v19, 4 }
 0x47d   : > { %v750_v21 = vadd.f32 %v749_v20, %v748_v19 }
 0x47f   : > { %v751_v22 = vrot.slane %v750_v21, 2 }
 0x481   : > { %v752_v23 = vadd.f32 %v751_v22, %v750_v21 }
 0x483   : > { %v753_v24 = vrot.slane %v752_v23, 1 }
 0x485   : > { %v754_v25 = vadd.f32 %v753_v24, %v752_v23 }
 0x487   : > { %972 = vlog2.f32 %v754_v25 }
 0x494   : > { %v973_v26 = vpop.eup %972 }
 0x495   : > { %v756_v27 = vmul.f32 0.6931472, %v973_v26 }
 0x497   : > { %v757_v28 = vsub.f32 %v745_v16, %v756_v27 }
 0x499   : > { %758 = vst.msk [vmem:[%s418_s22] sm:$0xf] %vm737_vm15, %v757_v28 }
 0x49a PF: > { %p14_p10 = scmp.ge.s32.totalorder %s1056_s28, 4   ;;  %s1140_s24 = smov %s992_s25 }
 0x49b   : > { %s1141_s25 = smov %s1063_s8  ;;  %s1142_s26 = smov %s1056_s28 }
 0x49c   :  { %16 = sbr.rel (!%p14_p10) target bundleno = 2 (0x2), region = 139 }

</bundles_post_ra>
